<compile_context>
chip_gen: v7x
topology: tpu7x:2x2x1
jax: 0.10.0
libtpu: 0.0.40
codegen_flags: <defaults>
</compile_context>

<pallas_src>
import functools

import jax
import jax.numpy as jnp
from jax.experimental import pallas as pl
from jax.experimental.pallas import tpu as pltpu


def _round_up(x, m):
    return ((x + m - 1) // m) * m


def _disc_kernel_out1(z_ref, w1_ref, b1_ref, w2_ref, b2_ref, o_ref):
    """out_dim == 1 path: layer 2 as a VPU/XLU reduce, lane-dense output."""
    # Layer 1 on the MXU, f32 accumulation.
    h = jnp.dot(z_ref[...], w1_ref[...], preferred_element_type=jnp.float32)
    h = jnp.maximum(h + b1_ref[...], 0.0)                  # (TILE_B, H) f32
    # Dropout: identity in eval mode.
    # Layer 2: a (TILE_B, H) x (H, 1) matmul would use ~1% of the MXU; do it
    # as a lane multiply + cross-lane sum (VALU/XLU slots are idle here).
    w2_row = w2_ref[...].astype(jnp.float32)               # (1, H)
    logits = jnp.sum(h * w2_row, axis=-1)                  # (TILE_B,)
    logits = logits + b2_ref[0, 0]                         # scalar bias (SMEM)
    # Lane-dense store: batch on the lane axis, (1, TILE_B).
    o_ref[...] = jax.nn.sigmoid(logits)[None, :].astype(o_ref.dtype)


def _disc_kernel_general(z_ref, w1_ref, b1_ref, w2_ref, b2_ref, o_ref):
    """General out_dim path: both layers on the MXU, f32 accumulation."""
    h = jnp.dot(z_ref[...], w1_ref[...], preferred_element_type=jnp.float32)
    h = jnp.maximum(h + b1_ref[...], 0.0)
    # Dropout: identity in eval mode.
    logits = jnp.dot(h.astype(w2_ref.dtype), w2_ref[...],
                     preferred_element_type=jnp.float32)
    logits = logits + b2_ref[...]
    o_ref[...] = jax.nn.sigmoid(logits).astype(o_ref.dtype)


@functools.partial(jax.jit, static_argnames=("tile_b", "use_bf16"))
def discriminator_forward(z, w1, b1, w2, b2, *, tile_b=1024, use_bf16=True):
    """Fused 2-layer MLP + sigmoid.

    z:  (B, latent_dim) float32
    w1: (latent_dim, hidden_dim)   (transposed vs. torch's (out, in))
    b1: (1, hidden_dim)
    w2: (hidden_dim, out_dim)
    b2: (1, out_dim)
    returns probs: (B, out_dim) float32
    """
    B, latent_dim = z.shape
    hidden_dim, out_dim = w2.shape
    assert w1.shape == (latent_dim, hidden_dim)
    assert b1.shape == (1, hidden_dim)
    assert b2.shape == (1, out_dim)

    # Tile bookkeeping: multiple of 128 for lane-dense stores / (8,128) rule.
    tile_b = max(128, min(_round_up(tile_b, 128), _round_up(B, 128)))
    b_pad = _round_up(B, tile_b)
    if b_pad != B:
        z = jnp.pad(z, ((0, b_pad - B), (0, 0)))
    grid = (b_pad // tile_b,)

    # Streamed operands in bf16 (halves HBM bytes); biases/elementwise in f32.
    in_dtype = jnp.bfloat16 if use_bf16 else jnp.float32
    itemsize = 2 if use_bf16 else 4
    z = z.astype(in_dtype)
    w1 = w1.astype(in_dtype)
    w2 = w2.astype(in_dtype)
    b1 = b1.astype(jnp.float32)
    b2 = b2.astype(jnp.float32)

    cost = pl.CostEstimate(
        flops=2 * b_pad * (latent_dim * hidden_dim + hidden_dim * out_dim),
        transcendentals=b_pad * out_dim,
        bytes_accessed=(b_pad * latent_dim * itemsize            # z stream
                        + b_pad * out_dim * 4                    # probs out
                        + (latent_dim * hidden_dim
                           + hidden_dim * out_dim) * itemsize    # weights
                        + (hidden_dim + out_dim) * 4),           # biases
    )
    params = pltpu.CompilerParams(dimension_semantics=("parallel",))

    if out_dim == 1:
        # Specialized AAE-discriminator path: lane-dense (1, B) output slab.
        w2_row = w2.reshape(1, hidden_dim)
        out = pl.pallas_call(
            _disc_kernel_out1,
            out_shape=jax.ShapeDtypeStruct((1, b_pad), jnp.float32),
            grid=grid,
            in_specs=[
                pl.BlockSpec((tile_b, latent_dim), lambda i: (i, 0)),
                pl.BlockSpec((latent_dim, hidden_dim), lambda i: (0, 0)),
                pl.BlockSpec((1, hidden_dim), lambda i: (0, 0)),
                pl.BlockSpec((1, hidden_dim), lambda i: (0, 0)),
                pl.BlockSpec(memory_space=pltpu.MemorySpace.SMEM),  # scalar b2
            ],
            out_specs=pl.BlockSpec((1, tile_b), lambda i: (0, i)),
            compiler_params=params,
            cost_estimate=cost,
        )(z, w1, b1, w2_row, b2)
        probs = out.reshape(b_pad, 1)[:B]
    else:
        out = pl.pallas_call(
            _disc_kernel_general,
            out_shape=jax.ShapeDtypeStruct((b_pad, out_dim), jnp.float32),
            grid=grid,
            in_specs=[
                pl.BlockSpec((tile_b, latent_dim), lambda i: (i, 0)),
                pl.BlockSpec((latent_dim, hidden_dim), lambda i: (0, 0)),
                pl.BlockSpec((1, hidden_dim), lambda i: (0, 0)),
                pl.BlockSpec((hidden_dim, out_dim), lambda i: (0, 0)),
                pl.BlockSpec((1, out_dim), lambda i: (0, 0)),
            ],
            out_specs=pl.BlockSpec((tile_b, out_dim), lambda i: (i, 0)),
            compiler_params=params,
            cost_estimate=cost,
        )(z, w1, b1, w2, b2)
        probs = out[:B]
    return probs


def init_params(key, latent_dim, hidden_dim, out_dim):
    """Deterministic init mimicking torch.nn.Linear (uniform +/- 1/sqrt(fan_in))."""
    k1, k2, k3, k4 = jax.random.split(key, 4)
    bound1 = 1.0 / jnp.sqrt(latent_dim)
    bound2 = 1.0 / jnp.sqrt(hidden_dim)
    # Stored as (in_features, out_features) so kernel does z @ W.
    w1 = jax.random.uniform(k1, (latent_dim, hidden_dim), jnp.float32,
                            -bound1, bound1)
    b1 = jax.random.uniform(k2, (1, hidden_dim), jnp.float32, -bound1, bound1)
    w2 = jax.random.uniform(k3, (hidden_dim, out_dim), jnp.float32,
                            -bound2, bound2)
    b2 = jax.random.uniform(k4, (1, out_dim), jnp.float32, -bound2, bound2)
    return w1, b1, w2, b2


if __name__ == "__main__":
    # Small shapes, but enough rows for a 4-step batch grid at tile_b=256.
    latent_dim, hidden_dim, out_dim = 16, 32, 1
    batch = 1024

    key = jax.random.PRNGKey(0)
    k_z, k_p = jax.random.split(key)
    z = jax.random.normal(k_z, (batch, latent_dim), jnp.float32)
    w1, b1, w2, b2 = init_params(k_p, latent_dim, hidden_dim, out_dim)

    probs = discriminator_forward(z, w1, b1, w2, b2, tile_b=256)
    probs = jax.block_until_ready(probs)
    assert probs.shape == (batch, out_dim)

    # Tight check against a reference using the same bf16 input casts.
    zb = z.astype(jnp.bfloat16).astype(jnp.float32)
    w1b = w1.astype(jnp.bfloat16).astype(jnp.float32)
    w2b = w2.astype(jnp.bfloat16).astype(jnp.float32)
    h_b = jnp.maximum(zb @ w1b + b1, 0.0)
    ref_bf16 = jax.nn.sigmoid(h_b @ w2b + b2)
    assert jnp.allclose(probs, ref_bf16, atol=1e-3, rtol=1e-3)

    # Loose check against the full-f32 reference (bf16 streaming error budget).
    h32 = jnp.maximum(z @ w1 + b1, 0.0)
    ref_f32 = jax.nn.sigmoid(h32 @ w2 + b2)
    assert jnp.allclose(probs, ref_f32, atol=3e-2, rtol=3e-2)

    print("KERNEL_OK")
</pallas_src>

<mosaic_0001>
module attributes {stable_mosaic.version = 11 : i64} {
  func.func @_disc_kernel_out1(%arg0: i32, %arg1: memref<256x16xbf16, #tpu.memory_space<vmem>>, %arg2: memref<16x32xbf16, #tpu.memory_space<vmem>>, %arg3: memref<1x32xf32, #tpu.memory_space<vmem>>, %arg4: memref<1x32xbf16, #tpu.memory_space<vmem>>, %arg5: memref<1x1xf32, #tpu.memory_space<smem>>, %arg6: memref<1x256xf32, #tpu.memory_space<vmem>>) attributes {dimension_semantics = [#tpu.dimension_semantics<parallel>], iteration_bounds = array<i64: 4>, scalar_prefetch = 0 : i64, scratch_operands = 0 : i64, tpu.core_type = #tpu.core_type<tc>, window_params = [{transform_indices = @transform_0, window_bounds = array<i64: 256, 16>}, {pipeline_mode = #tpu.pipeline_mode<synchronous>, transform_indices = @transform_1, window_bounds = array<i64: 16, 32>}, {pipeline_mode = #tpu.pipeline_mode<synchronous>, transform_indices = @transform_2, window_bounds = array<i64: 1, 32>}, {pipeline_mode = #tpu.pipeline_mode<synchronous>, transform_indices = @transform_3, window_bounds = array<i64: 1, 32>}, {transform_indices = @transform_4, window_bounds = array<i64: 1, 1>}, {transform_indices = @transform_5, window_bounds = array<i64: 1, 256>}]} {
    %c0 = arith.constant 0 : index
    %c0_0 = arith.constant 0 : index
    %0 = vector.load %arg1[%c0, %c0_0] : memref<256x16xbf16, #tpu.memory_space<vmem>>, vector<256x16xbf16>
    %c0_1 = arith.constant 0 : index
    %c0_2 = arith.constant 0 : index
    %1 = vector.load %arg2[%c0_1, %c0_2] : memref<16x32xbf16, #tpu.memory_space<vmem>>, vector<16x32xbf16>
    %cst = arith.constant dense<0.000000e+00> : vector<256x32xf32>
    %2 = tpu.matmul %0, %1, %cst {dimension_numbers = #tpu.dot_dimension_numbers<[1], [0], [0], [1], [0, 0, 1, 1], [], []>} : vector<256x16xbf16>, vector<16x32xbf16>, vector<256x32xf32> -> vector<256x32xf32>
    %c0_3 = arith.constant 0 : index
    %c0_4 = arith.constant 0 : index
    %3 = vector.load %arg3[%c0_3, %c0_4] : memref<1x32xf32, #tpu.memory_space<vmem>>, vector<1x32xf32>
    %4 = vector.broadcast %3 : vector<1x32xf32> to vector<256x32xf32>
    %5 = arith.addf %2, %4 : vector<256x32xf32>
    %cst_5 = arith.constant 0.000000e+00 : f32
    %6 = vector.broadcast %cst_5 : f32 to vector<256x32xf32>
    %7 = arith.maximumf %5, %6 : vector<256x32xf32>
    %c0_6 = arith.constant 0 : index
    %c0_7 = arith.constant 0 : index
    %8 = vector.load %arg4[%c0_6, %c0_7] : memref<1x32xbf16, #tpu.memory_space<vmem>>, vector<1x32xbf16>
    %9 = arith.extf %8 : vector<1x32xbf16> to vector<1x32xf32>
    %10 = vector.broadcast %9 : vector<1x32xf32> to vector<256x32xf32>
    %11 = arith.mulf %7, %10 : vector<256x32xf32>
    %cst_8 = arith.constant dense<0.000000e+00> : vector<256xf32>
    %12 = vector.multi_reduction <add>, %11, %cst_8 [1] : vector<256x32xf32> to vector<256xf32>
    %c0_9 = arith.constant 0 : index
    %c0_10 = arith.constant 0 : index
    %13 = memref.load %arg5[%c0_9, %c0_10] : memref<1x1xf32, #tpu.memory_space<smem>>
    %14 = vector.broadcast %13 : f32 to vector<256xf32>
    %15 = arith.addf %12, %14 : vector<256xf32>
    %16 = arith.negf %15 : vector<256xf32>
    %17 = math.exp %16 : vector<256xf32>
    %cst_11 = arith.constant 1.000000e+00 : f32
    %18 = vector.broadcast %cst_11 : f32 to vector<256xf32>
    %19 = arith.addf %18, %17 : vector<256xf32>
    %20 = arith.divf %18, %19 : vector<256xf32>
    %21 = vector.shape_cast %20 : vector<256xf32> to vector<1x256xf32>
    %c0_12 = arith.constant 0 : index
    %c0_13 = arith.constant 0 : index
    %22 = vector.load %arg6[%c0_12, %c0_13] : memref<1x256xf32, #tpu.memory_space<vmem>>, vector<1x256xf32>
    tpu.vector_store %arg6[%c0_12, %c0_13], %21 {strides = array<i32>} : memref<1x256xf32, #tpu.memory_space<vmem>>, vector<1x256xf32>,
    return
  }
  func.func @transform_0(%arg0: i32) -> (i32, i32) {
    %c0_i32 = arith.constant 0 : i32
    %c0_i32_0 = arith.constant 0 : i32
    return %arg0, %c0_i32 : i32, i32
  }
  func.func @transform_1(%arg0: i32) -> (i32, i32) {
    %c0_i32 = arith.constant 0 : i32
    %c0_i32_0 = arith.constant 0 : i32
    %c0_i32_1 = arith.constant 0 : i32
    return %c0_i32, %c0_i32_0 : i32, i32
  }
  func.func @transform_2(%arg0: i32) -> (i32, i32) {
    %c0_i32 = arith.constant 0 : i32
    %c0_i32_0 = arith.constant 0 : i32
    %c0_i32_1 = arith.constant 0 : i32
    return %c0_i32, %c0_i32_0 : i32, i32
  }
  func.func @transform_3(%arg0: i32) -> (i32, i32) {
    %c0_i32 = arith.constant 0 : i32
    %c0_i32_0 = arith.constant 0 : i32
    %c0_i32_1 = arith.constant 0 : i32
    return %c0_i32, %c0_i32_0 : i32, i32
  }
  func.func @transform_4(%arg0: i32) -> (i32, i32) {
    %c0_i32 = arith.constant 0 : i32
    %c0_i32_0 = arith.constant 0 : i32
    %c0_i32_1 = arith.constant 0 : i32
    return %c0_i32, %c0_i32_0 : i32, i32
  }
  func.func @transform_5(%arg0: i32) -> (i32, i32) {
    %c0_i32 = arith.constant 0 : i32
    %c0_i32_0 = arith.constant 0 : i32
    return %c0_i32, %arg0 : i32, i32
  }
}

</mosaic_0001>

<bundles_post_ra>
// kernel: discriminator_forward.1
= control target key start
LH: loop header
LB: loop body
LE: loop exit
PB: predicated region body
PF: predicated region fallthrough
CT: control target
= control target key end

     0   :  { %s5560_s0 = inlined_call_operand.vmem [shape: bf16[1024,16], index: 0, kind: input, shape index: {}]   ;;  %s5561_s1 = inlined_call_operand.vmem [shape: bf16[16,32], index: 1, kind: input, shape index: {}]   ;;  %s5562_s2 = inlined_call_operand.vmem [shape: f32[1,32], index: 2, kind: input, shape index: {}]   ;;  %s5563_s3 = inlined_call_operand.vmem [shape: bf16[1,32], index: 3, kind: input, shape index: {}]   ;;  %s5564_s4 = inlined_call_operand.<no memory space> [shape: f32[1,1], index: 4, kind: input, shape index: {}]   ;;  %s5565_s5 = inlined_call_operand.hbm [shape: f32[1,1024], index: 5, kind: output, shape index: {}]  }
   0x1   :  { %10 = sst [smem:[#allocation2]] %s5564_s4 }
   0x2   :  { %11 = vsyncpa [#allocation4], 0 }
   0x3   :  { %13 = vsyncpa [#allocation4 + $0x1], 0  ;;  %s4383_s20 = smov 0   ;;  %s4385_s21 = smov 0  }
   0x4   :  { %s4387_s22 = smov 0   ;;  %s4389_s23 = smov 0  }
   0x5 LB: > { %s3962_s4 = sadd.s32 4294967295, %s4345_s23   ;;  %s3963_s24 = sadd.s32 4294967294, %s4345_s23   ;;  %s4345_s23 = sphi %s4389_s23, %s5571_s23   ;;  %s4341_s22 = sphi %s4387_s22, %s5570_s22   ;;  %s4337_s21 = sphi %s4385_s21, %s5569_s21   ;;  %s4333_s20 = sphi %s4383_s20, %s5568_s20  }
   0x6   : > { %s4406_s25 = sadd.s32 1, %s4345_s23   ;;  %s136_s26 = sadd.s32 1, %s4341_s22 }
   0x7   : > { %s133_s27 = ssub.s32 %s4345_s23, %s4406_s25  ;;  %p146_p0 = scmp.ne.s32.totalorder %s4341_s22, %s4337_s21 }
   0x8   : > { %p134_p1 = scmp.eq.s32.totalorder %s133_s27, 0  ;;  %p147_p2 = scmp.eq.s32.totalorder %s3962_s4, 3 }
   0x9   : > { %p152_p3 = scmp.ne.s32.totalorder %s4337_s21, %s4333_s20  ;;  %p153_p4 = scmp.eq.s32.totalorder %s3963_s24, 3 }
   0xa   : > { %s4416_s28 = scalar_select %p134_p1, %s4341_s22, %s136_s26  }
   0xb   : > { %p4418_p5 = por %p147_p2, %p146_p0  ;;  %p4422_p6 = por %p153_p4, %p152_p3 }
   0xc   : > { %p3966_p7 = scmp.ge.s32.totalorder %s4345_s23, 1  ;;  %p192_p8 = scmp.lt.s32.totalorder %s4345_s23, 5 }
   0xe   : > { %p193_p9 = pnand %p3966_p7, %p192_p8 }
   0xf   : > { %v4138_v0 = vld [vmem:[%s5561_s1] sm:$0xff] (!%p193_p9)   ;;  %s4431_s8 = sshll.u32 (!%p193_p9), %s3962_s4, 5  ;;  %vm355_vm0 = vcmask (!%p193_p9), 130048   ;;  %v599_v17 = vlaneseq (!%p193_p9)  ;;  %vm635_vm1 = vcmask (!%p193_p9), 261120   ;;  %s732_s18 = sld [smem:[#allocation2]] (!%p193_p9)  ;;  %vm3689_vm2 = vcmask (!%p193_p9), 130112  }
  0x10   : > { %196 = sbr.rel (%p193_p9) target bundleno = 771 (0x303), region = 40  ;;  %p221_p10 = scmp.lt.s32.totalorder (!%p193_p9), %s4431_s8, 127  ;;  %4059 = vmatprep.subr.bf16.mxu0 (!%p193_p9), %v4138_v0  ;;  %4093 = vmatprep.subr.bf16.mxu1 (!%p193_p9), %v4138_v0  ;;  %v597_v19 = vld [vmem:[%s5563_s3] sm:$0x1] (!%p193_p9)  ;;  %vm3696_vm3 = vcmask (!%p193_p9), 195712   ;;  %vm3703_vm4 = vcmask (!%p193_p9), 261312  }
  0x11   : > { %4060 = vmatpush3.bf16.msra.mxu0 (!%p193_p9), %v4138_v0  ;;  %4094 = vmatpush3.bf16.msra.mxu1 (!%p193_p9), %v4138_v0  ;;  %v4473_v18 = vshrl.u32 (!%p193_p9), %v599_v17, 7  ;;  %v598_v20 = vunpack.c.l.bf16 (!%p193_p9), %v597_v19  ;;  %v4484_v22 = vld [vmem:[%s5562_s2] ss:$0 sm:$0xff] (!%p193_p9)  ;;  %vm3710_vm5 = vcmask (!%p193_p9), 326912   ;;  %vm3717_vm6 = vcmask (!%p193_p9), 392512   ;;  %s217_s19 = sand.u32 (!%p193_p9), 1, %s4337_s21   ;;  %s5518_s7 = scalar_lea.hbm (!%p193_p9), %s5565_s5, %s4431_s8 }
  0x12   : > { %vm3724_vm7 = vcmask (!%p193_p9), 458112   ;;  %vm3731_vm8 = vcmask (!%p193_p9), 523712   ;;  %vm3738_vm9 = vcmask (!%p193_p9), 589312   ;;  %vm3745_vm10 = vcmask (!%p193_p9), 654912   ;;  %s3967_s4 = sshll.u32 (!%p193_p9), %s217_s19, 1  ;;  %s4349_s11 = smov (!%p193_p9), [#allocation3]  }
  0x13   : > { %v4479_v21 = vsub.s32 (!%p193_p9), 0, %v4473_v18  ;;  %vm3752_vm11 = vcmask (!%p193_p9), 720512   ;;  %vm3759_vm12 = vcmask (!%p193_p9), 786112   ;;  %vm3766_vm13 = vcmask (!%p193_p9), 851712   ;;  %s219_s24 = scalar_lea.vmem (!%p193_p9), [#allocation3], %s3967_s4  ;;  %s4287_s12 = sshll.u32 (!%p193_p9), %s4349_s11, 4  ;;  %s4288_s12 = int_to_ptr.vmem [resolvable:$false] %s4287_s12 }
  0x14   : > { %vm3773_vm14 = vcmask (!%p193_p9), 917312   ;;  %vm3780_vm15 = vcmask (!%p193_p9), 982912   ;;  %s3904_s26 = sshll.u32 (!%p193_p9), %s219_s24, 4  ;;  %s5520_s26 = int_to_ptr.vmem [resolvable:$true] %s3904_s26 }
  0x15   : > { %v4488_v26 = vrot.slane (!%p193_p9), %v598_v20, %v4479_v21  ;;  %p4290_p0 = scmp.lt.s32.totalorder (!%p193_p9), %s5520_s26, %s4288_s12 }
  0x17   : > { %s222_s9 = scalar_select %p221_p10, %s4431_s8, 127 }
  0x19   : > { %s3969_s10 = sshll.u32 %s222_s9, 2  ;;  %s3890_s9 = scalar_lea.sflag [#allocation4], %s217_s19 }
  0x1a   : > { %s4438_s13 = scalar_lea.vmem %s5560_s0, %s3969_s10  ;;  %s4283_s10 = scalar_lea.vmem %s5520_s26, 32 }
  0x1b   : > { %v4139_v1 = vld [vmem:[%s4438_s13] sm:$0xff]   ;;  %v4140_v2 = vld [vmem:[%s4438_s13 + $0x8] sm:$0xff]   ;;  %v4143_v5 = vld [vmem:[%s4438_s13 + $0x50] sm:$0xff]   ;;  %p4284_p11 = scmp.ne.s32.totalorder %s5520_s26, %s4283_s10 }
  0x1c   : > { %4061 = vmatprep.mubr.msk.bf16.mxu0 %vm355_vm0, %v4139_v1  ;;  %v4141_v3 = vld [vmem:[%s4438_s13 + $0x40] sm:$0xff]   ;;  %v4142_v4 = vld [vmem:[%s4438_s13 + $0x48] sm:$0xff]   ;;  %v4144_v6 = vld [vmem:[%s4438_s13 + $0x10] sm:$0xff]  }
  0x1d   : > { %4062 = vmatmul.mubr.msk.bf16.vlgmr.msra.gmra.mrb[0].mxu0 %vm355_vm0, %v4140_v2  ;;  %4077 = vmatprep.mubr.msk.bf16.mxu1 %vm355_vm0, %v4141_v3  ;;  %v4146_v7 = vld [vmem:[%s4438_s13 + $0x18] sm:$0xff]   ;;  %v4148_v9 = vld [vmem:[%s4438_s13 + $0x20] sm:$0xff]   ;;  %v4150_v11 = vld [vmem:[%s4438_s13 + $0x28] sm:$0xff]   ;;  %p4285_p12 = pnand %p4284_p11, %p4418_p5 }
  0x1e   : > { %4078 = vmatmul.mubr.msk.bf16.vlgmr.msra.gmra.mrb[0].mxu1 %vm355_vm0, %v4142_v4  ;;  %4065 = vmatprep.mubr.msk.bf16.mxu0 %vm355_vm0, %v4144_v6  ;;  %v4145_v8 = vld [vmem:[%s4438_s13 + $0x58] sm:$0xff]   ;;  %v4147_v10 = vld [vmem:[%s4438_s13 + $0x60] sm:$0xff]   ;;  %v4152_v12 = vld [vmem:[%s4438_s13 + $0x30] sm:$0xff]  }
  0x1f   : > { %4081 = vmatprep.mubr.msk.bf16.mxu1 %vm355_vm0, %v4143_v5  ;;  %v4149_v13 = vld [vmem:[%s4438_s13 + $0x68] sm:$0xff]   ;;  %v4151_v14 = vld [vmem:[%s4438_s13 + $0x70] sm:$0xff]   ;;  %v4154_v15 = vld [vmem:[%s4438_s13 + $0x38] sm:$0xff]   ;;  %p4286_p13 = pneg %p4285_p12 }
  0x20   : > { %v4153_v16 = vld [vmem:[%s4438_s13 + $0x78] sm:$0xff]   ;;  %s4289_s13 = scalar_lea.vmem %s4288_s12, 64 }
  0x21   : > { %p4291_p1 = scmp.lt.s32.totalorder %s4289_s13, %s4283_s10 }
  0x23   : > { %p4292_p2 = por %p4291_p1, %p4290_p0 }
  0x25   : > { %4066 = vmatmul.mubr.msk.bf16.gmra.mrb[4].mxu0 %vm355_vm0, %v4146_v7  ;;  %p4293_p3 = pnand %p4292_p2, %p4286_p13 }
  0x26   : > { %4069 = vmatprep.mubr.msk.bf16.mxu0 %vm355_vm0, %v4148_v9  ;;  %4082 = vmatmul.mubr.msk.bf16.gmra.mrb[4].mxu1 %vm355_vm0, %v4145_v8 }
  0x27   : > { %4085 = vmatprep.mubr.msk.bf16.mxu1 %vm355_vm0, %v4147_v10 }
  0x2d   : > { %4070 = vmatmul.mubr.msk.bf16.gmra.mrb[8].mxu0 %vm355_vm0, %v4150_v11 }
  0x2e   : > { %4073 = vmatprep.mubr.msk.bf16.mxu0 %vm355_vm0, %v4152_v12  ;;  %4086 = vmatmul.mubr.msk.bf16.gmra.mrb[8].mxu1 %vm355_vm0, %v4149_v13 }
  0x2f   : > { %4089 = vmatprep.mubr.msk.bf16.mxu1 %vm355_vm0, %v4151_v14 }
  0x35   : > { %4074 = vmatmul.mubr.msk.bf16.gmra.mrb[12].mxu0 %vm355_vm0, %v4154_v15 }
  0x36   : > { %4090 = vmatmul.mubr.msk.bf16.gmra.mrb[12].mxu1 %vm355_vm0, %v4153_v16  ;;  %vm3787_vm0 = vcmask 1048512  }
  0xf0   : > { %v4063_v23 = vpop.f32.mrb[0].mxu0 }
  0xf1   : > { %v447_v24 = vadd.f32 %v4063_v23, %v4484_v22  ;;  %v438_v25 = vpop.f32.mrb[1].mxu0  ;;  %v4079_v28 = vpop.f32.mrb[0].mxu1 }
  0xf2   : > { %v439_v27 = vadd.f32 %v4484_v22, %v438_v25  ;;  %v4064_v29 = vpop.f32.mrb[2].mxu0  ;;  %v511_v31 = vadd.f32 %v4079_v28, %v4484_v22  ;;  %v502_v32 = vpop.f32.mrb[1].mxu1 }
  0xf3   : > { %v567_v30 = vmax.f32 %v447_v24, 0.0  ;;  %v441_v33 = vpop.f32.mrb[3].mxu0  ;;  %v503_v35 = vadd.f32 %v4484_v22, %v502_v32  ;;  %v4080_v37 = vpop.f32.mrb[2].mxu1  ;;  %v450_v42 = vadd.f32 %v4064_v29, %v4484_v22 }
  0xf4   : > { %v565_v34 = vmax.f32 %v439_v27, 0.0  ;;  %v442_v36 = vadd.f32 %v4484_v22, %v441_v33  ;;  %v583_v38 = vmax.f32 %v511_v31, 0.0  ;;  %v514_v39 = vadd.f32 %v4080_v37, %v4484_v22  ;;  %v505_v40 = vpop.f32.mrb[3].mxu1 }
  0xf5   : > { %v605_v41 = vmul.f32 %v4488_v26, %v567_v30  ;;  %v581_v44 = vmax.f32 %v503_v35, 0.0  ;;  %v506_v49 = vadd.f32 %v4484_v22, %v505_v40  ;;  %v568_v58 = vmax.f32 %v450_v42, 0.0 }
  0xf6   : > { %v603_v43 = vmul.f32 %v4488_v26, %v565_v34  ;;  %v584_v45 = vmax.f32 %v514_v39, 0.0  ;;  %v621_v47 = vmul.f32 %v4488_v26, %v583_v38  ;;  %v566_v48 = vmax.f32 %v442_v36, 0.0 }
  0xf7   : > { %v642_v46 = vsel %vm635_vm1, %v605_v41, 0.0  ;;  %v619_v61 = vmul.f32 %v4488_v26, %v581_v44  ;;  %v582_v0 = vmax.f32 %v506_v49, 0.0  ;;  %v606_v9 = vmul.f32 %v4488_v26, %v568_v58 }
  0xf8   : > { %643 = vadd.xlane.f32.xlu1 %v642_v46  ;;  %v636_v50 = vsel %vm635_vm1, %v603_v43, 0.0  ;;  %v4067_v51 = vpop.f32.mrb[4].mxu0  ;;  %v690_v52 = vsel %vm635_vm1, %v621_v47, 0.0  ;;  %v622_v53 = vmul.f32 %v4488_v26, %v584_v45  ;;  %v604_v1 = vmul.f32 %v4488_v26, %v566_v48 }
  0xf9   : > { %637 = vadd.xlane.f32.xlu0 %v636_v50  ;;  %v454_v54 = vpop.f32.mrb[5].mxu0  ;;  %v4083_v55 = vpop.f32.mrb[4].mxu1  ;;  %v463_v56 = vadd.f32 %v4067_v51, %v4484_v22  ;;  %v684_v8 = vsel %vm635_vm1, %v619_v61, 0.0  ;;  %v620_v11 = vmul.f32 %v4488_v26, %v582_v0  ;;  %v645_v25 = vsel %vm635_vm1, %v606_v9, 0.0 }
  0xfa   : > { %v4068_v57 = vpop.f32.mrb[6].mxu0  ;;  %v693_v59 = vsel %vm635_vm1, %v622_v53, 0.0  ;;  %v527_v60 = vadd.f32 %v4083_v55, %v4484_v22  ;;  %v518_v62 = vpop.f32.mrb[5].mxu1  ;;  %v455_v7 = vadd.f32 %v4484_v22, %v454_v54  ;;  %v639_v10 = vsel %vm635_vm1, %v604_v1, 0.0 }
  0xfb   : > { %v457_v63 = vpop.f32.mrb[7].mxu0  ;;  %v4084_v2 = vpop.f32.mrb[6].mxu1  ;;  %v519_v4 = vadd.f32 %v4484_v22, %v518_v62  ;;  %v571_v6 = vmax.f32 %v463_v56, 0.0  ;;  %v466_v29 = vadd.f32 %v4068_v57, %v4484_v22  ;;  %v687_v30 = vsel %vm635_vm1, %v620_v11, 0.0 }
  0xfc   : > { %691 = vadd.xlane.f32.xlu1 %v690_v52  ;;  %v587_v3 = vmax.f32 %v527_v60, 0.0  ;;  %v521_v5 = vpop.f32.mrb[7].mxu1  ;;  %v530_v14 = vadd.f32 %v4084_v2, %v4484_v22  ;;  %v569_v19 = vmax.f32 %v455_v7, 0.0  ;;  %v458_v40 = vadd.f32 %v4484_v22, %v457_v63 }
  0xfd   : > { %694 = vadd.xlane.f32.xlu0 %v693_v59  ;;  %v585_v13 = vmax.f32 %v519_v4, 0.0  ;;  %v609_v20 = vmul.f32 %v4488_v26, %v571_v6  ;;  %v522_v38 = vadd.f32 %v4484_v22, %v521_v5  ;;  %v572_v39 = vmax.f32 %v466_v29, 0.0 }
  0xfe   : > { %v625_v15 = vmul.f32 %v4488_v26, %v587_v3  ;;  %v588_v32 = vmax.f32 %v530_v14, 0.0  ;;  %v607_v37 = vmul.f32 %v4488_v26, %v569_v19  ;;  %v570_v53 = vmax.f32 %v458_v40, 0.0 }
  0xff   : > { %v623_v34 = vmul.f32 %v4488_v26, %v585_v13  ;;  %v654_v36 = vsel %vm635_vm1, %v609_v20, 0.0  ;;  %v586_v50 = vmax.f32 %v522_v38, 0.0  ;;  %v610_v54 = vmul.f32 %v4488_v26, %v572_v39 }
 0x100   : > { %685 = vadd.xlane.f32.xlu1 %v684_v8  ;;  %v4071_v12 = vpop.f32.mrb[8].mxu0  ;;  %v702_v33 = vsel %vm635_vm1, %v625_v15, 0.0  ;;  %v626_v44 = vmul.f32 %v4488_v26, %v588_v32  ;;  %v648_v46 = vsel %vm635_vm1, %v607_v37, 0.0  ;;  %v608_v0 = vmul.f32 %v4488_v26, %v570_v53 }
 0x101   : > { %640 = vadd.xlane.f32.xlu0 %v639_v10  ;;  %v470_v16 = vpop.f32.mrb[9].mxu0  ;;  %v4087_v23 = vpop.f32.mrb[8].mxu1  ;;  %v696_v42 = vsel %vm635_vm1, %v623_v34, 0.0  ;;  %v479_v47 = vadd.f32 %v4071_v12, %v4484_v22  ;;  %v624_v62 = vmul.f32 %v4488_v26, %v586_v50  ;;  %v657_v63 = vsel %vm635_vm1, %v610_v54, 0.0 }
 0x102   : > { %v4072_v24 = vpop.f32.mrb[10].mxu0  ;;  %v534_v27 = vpop.f32.mrb[9].mxu1  ;;  %v543_v43 = vadd.f32 %v4087_v23, %v4484_v22  ;;  %v705_v57 = vsel %vm635_vm1, %v626_v44, 0.0  ;;  %v471_v61 = vadd.f32 %v4484_v22, %v470_v16  ;;  %v651_v8 = vsel %vm635_vm1, %v608_v0, 0.0 }
 0x103   : > { %v4519_v28 = vpop.f32.mrb[11].mxu0  ;;  %v4088_v31 = vpop.f32.mrb[10].mxu1  ;;  %v535_v58 = vadd.f32 %v4484_v22, %v534_v27  ;;  %v575_v60 = vmax.f32 %v479_v47, 0.0  ;;  %v482_v5 = vadd.f32 %v4072_v24, %v4484_v22  ;;  %v699_v7 = vsel %vm635_vm1, %v624_v62, 0.0 }
 0x104   : > { %646 = vadd.xlane.f32.xlu1 %v645_v25  ;;  %v537_v35 = vpop.f32.mrb[11].mxu1  ;;  %v591_v56 = vmax.f32 %v543_v43, 0.0  ;;  %v546_v2 = vadd.f32 %v4088_v31, %v4484_v22  ;;  %v573_v4 = vmax.f32 %v471_v61, 0.0  ;;  %v474_v16 = vadd.f32 %v4484_v22, %v4519_v28 }
 0x105   : > { %688 = vadd.xlane.f32.xlu0 %v687_v30  ;;  %v589_v1 = vmax.f32 %v535_v58, 0.0  ;;  %v613_v6 = vmul.f32 %v4488_v26, %v575_v60  ;;  %v576_v12 = vmax.f32 %v482_v5, 0.0  ;;  %v538_v15 = vadd.f32 %v4484_v22, %v537_v35 }
 0x106   : > { %v629_v3 = vmul.f32 %v4488_v26, %v591_v56  ;;  %v592_v9 = vmax.f32 %v546_v2, 0.0  ;;  %v611_v14 = vmul.f32 %v4488_v26, %v573_v4  ;;  %v574_v30 = vmax.f32 %v474_v16, 0.0 }
 0x107   : > { %v627_v11 = vmul.f32 %v4488_v26, %v589_v1  ;;  %v666_v13 = vsel %vm635_vm1, %v613_v6, 0.0  ;;  %v614_v27 = vmul.f32 %v4488_v26, %v576_v12  ;;  %v590_v29 = vmax.f32 %v538_v15, 0.0 }
 0x108   : > { %703 = vadd.xlane.f32.xlu1 %v702_v33  ;;  %v4075_v41 = vpop.f32.mrb[12].mxu0  ;;  %v714_v10 = vsel %vm635_vm1, %v629_v3, 0.0  ;;  %v630_v23 = vmul.f32 %v4488_v26, %v592_v9  ;;  %v660_v24 = vsel %vm635_vm1, %v611_v14, 0.0  ;;  %v612_v37 = vmul.f32 %v4488_v26, %v574_v30 }
 0x109   : > { %655 = vadd.xlane.f32.xlu0 %v654_v36  ;;  %v486_v45 = vpop.f32.mrb[13].mxu0  ;;  %v4091_v48 = vpop.f32.mrb[12].mxu1  ;;  %v708_v19 = vsel %vm635_vm1, %v627_v11, 0.0  ;;  %v495_v25 = vadd.f32 %v4075_v41, %v4484_v22  ;;  %v669_v34 = vsel %vm635_vm1, %v614_v27, 0.0  ;;  %v628_v36 = vmul.f32 %v4488_v26, %v590_v29 }
 0x10a   : > { %v4534_v49 = vpop.f32.mrb[14].mxu0  ;;  %v550_v51 = vpop.f32.mrb[13].mxu1  ;;  %v559_v20 = vadd.f32 %v4091_v48, %v4484_v22  ;;  %v717_v28 = vsel %vm635_vm1, %v630_v23, 0.0  ;;  %v487_v35 = vadd.f32 %v4484_v22, %v486_v45  ;;  %v663_v45 = vsel %vm635_vm1, %v612_v37, 0.0 }
 0x10b   : > { %v489_v52 = vpop.f32.mrb[15].mxu0  ;;  %v4537_v55 = vpop.f32.mrb[14].mxu1  ;;  %v551_v32 = vadd.f32 %v4484_v22, %v550_v51  ;;  %v579_v33 = vmax.f32 %v495_v25, 0.0  ;;  %v711_v44 = vsel %vm635_vm1, %v628_v36, 0.0  ;;  %v498_v51 = vadd.f32 %v4534_v49, %v4484_v22 }
 0x10c   : > { %697 = vadd.xlane.f32.xlu1 %v696_v42  ;;  %v553_v59 = vpop.f32.mrb[15].mxu1  ;;  %v595_v31 = vmax.f32 %v559_v20, 0.0  ;;  %v577_v41 = vmax.f32 %v487_v35, 0.0  ;;  %v490_v42 = vadd.f32 %v4484_v22, %v489_v52  ;;  %v4594_v2 = vstv %s732_s18 }
 0x10d   : > { %649 = vadd.xlane.f32.xlu0 %v648_v46  ;;  %v593_v38 = vmax.f32 %v551_v32, 0.0  ;;  %v554_v39 = vadd.f32 %v4484_v22, %v553_v59  ;;  %v617_v43 = vmul.f32 %v4488_v26, %v579_v33  ;;  %v562_v46 = vadd.f32 %v4537_v55, %v4484_v22 }
 0x10e   : > { %v633_v40 = vmul.f32 %v4488_v26, %v595_v31  ;;  %v578_v52 = vmax.f32 %v490_v42, 0.0  ;;  %v615_v54 = vmul.f32 %v4488_v26, %v577_v41  ;;  %v580_v58 = vmax.f32 %v498_v51, 0.0 }
 0x10f   : > { %v594_v47 = vmax.f32 %v554_v39, 0.0  ;;  %v631_v50 = vmul.f32 %v4488_v26, %v593_v38  ;;  %v678_v53 = vsel %vm635_vm1, %v617_v43, 0.0  ;;  %v596_v56 = vmax.f32 %v562_v46, 0.0 }
 0x110   : > { %706 = vadd.xlane.f32.xlu1 %v705_v57  ;;  %v726_v48 = vsel %vm635_vm1, %v633_v40, 0.0  ;;  %v672_v59 = vsel %vm635_vm1, %v615_v54, 0.0  ;;  %v616_v60 = vmul.f32 %v4488_v26, %v578_v52  ;;  %v618_v62 = vmul.f32 %v4488_v26, %v580_v58 }
 0x111   : > { %658 = vadd.xlane.f32.xlu0 %v657_v63  ;;  %v720_v57 = vsel %vm635_vm1, %v631_v50, 0.0  ;;  %v632_v55 = vmul.f32 %v4488_v26, %v594_v47  ;;  %v634_v49 = vmul.f32 %v4488_v26, %v596_v56  ;;  %v4347_v63 = vmov 0  }
 0x112   : > { %v675_v61 = vsel %vm635_vm1, %v616_v60, 0.0  ;;  %4136 = vset.pattern.permute.xlu1 %v4347_v63  ;;  %4137 = vset.pattern.permute.xlu0 %v4347_v63  ;;  %v681_v1 = vsel %vm635_vm1, %v618_v62, 0.0  ;;  %v4609_v54 = vsub.s32 1, %v4473_v18  ;;  %v4612_v56 = vsub.s32 2, %v4473_v18 }
 0x113   : > { %v723_v22 = vsel %vm635_vm1, %v632_v55, 0.0  ;;  %v729_v0 = vsel %vm635_vm1, %v634_v49, 0.0  ;;  %v4616_v62 = vsub.s32 3, %v4473_v18  ;;  %vm3886_vm1 = vcmp.lt.s32.totalorder %v599_v17, 256 }
 0x114   : > { %700 = vadd.xlane.f32.xlu1 %v699_v7 }
 0x115   : > { %652 = vadd.xlane.f32.xlu0 %v651_v8 }
 0x118   : > { %715 = vadd.xlane.f32.xlu1 %v714_v10 }
 0x119   : > { %667 = vadd.xlane.f32.xlu0 %v666_v13 }
 0x11c   : > { %709 = vadd.xlane.f32.xlu1 %v708_v19 }
 0x11d   : > { %661 = vadd.xlane.f32.xlu0 %v660_v24 }
 0x120   : > { %718 = vadd.xlane.f32.xlu1 %v717_v28 }
 0x121   : > { %670 = vadd.xlane.f32.xlu0 %v669_v34 }
 0x124   : > { %712 = vadd.xlane.f32.xlu1 %v711_v44 }
 0x125   : > { %664 = vadd.xlane.f32.xlu0 %v663_v45  ;;  %v4348_v45 = vmov 1966171168  }
 0x126   : > { %v2019_v46 = vunpack.c.l.s4 %v4348_v45 }
 0x128   : > { %727 = vadd.xlane.f32.xlu1 %v726_v48  ;;  %v2020_v60 = vunpack.c.0.s8 %v2019_v46 }
 0x129   : > { %679 = vadd.xlane.f32.xlu0 %v678_v53 }
 0x12c   : > { %721 = vadd.xlane.f32.xlu1 %v720_v57 }
 0x12d   : > { %673 = vadd.xlane.f32.xlu0 %v672_v59 }
 0x130   : > { %724 = vadd.xlane.f32.xlu1 %v723_v22 }
 0x131   : > { %676 = vadd.xlane.f32.xlu0 %v675_v61 }
 0x134   : > { %730 = vadd.xlane.f32.xlu1 %v729_v0  ;;  %v4620_v0 = vsub.s32 4, %v4473_v18 }
 0x135   : > { %682 = vadd.xlane.f32.xlu0 %v681_v1  ;;  %v4623_v1 = vsub.s32 5, %v4473_v18 }
 0x185   : > { %v644_v3 = vpop.xlane.xlu1 %643 }
 0x186   : > { %v736_v4 = vadd.f32 %v4594_v2, %v644_v3  ;;  %v638_v5 = vpop.xlane.xlu0 %637 }
 0x187   : > { %v734_v26 = vadd.f32 %v4594_v2, %v638_v5  ;;  %v4626_v5 = vsub.s32 6, %v4473_v18 }
 0x188   : > { %v4006_v6 = vmul.f32 -1.442695, %v736_v4 }
 0x189   : > { %v4004_v7 = vmul.f32 -1.442695, %v734_v26  ;;  %v692_v8 = vpop.xlane.xlu1 %691  ;;  %v4629_v26 = vsub.s32 7, %v4473_v18 }
 0x18a   : > { %4155 = vpow2.f32 %v4006_v6  ;;  %v752_v9 = vadd.f32 %v4594_v2, %v692_v8  ;;  %v695_v10 = vpop.xlane.xlu0 %694 }
 0x18b   : > { %4157 = vpow2.f32 %v4004_v7  ;;  %v753_v11 = vadd.f32 %v4594_v2, %v695_v10  ;;  %v4632_v10 = vsub.s32 %v2020_v60, %v4473_v18 }
 0x18c   : > { %v4022_v12 = vmul.f32 -1.442695, %v752_v9 }
 0x18d   : > { %v4023_v13 = vmul.f32 -1.442695, %v753_v11  ;;  %v686_v14 = vpop.xlane.xlu1 %685 }
 0x18e   : > { %4159 = vpow2.f32 %v4022_v12  ;;  %v750_v15 = vadd.f32 %v4594_v2, %v686_v14  ;;  %v641_v16 = vpop.xlane.xlu0 %640 }
 0x18f   : > { %4161 = vpow2.f32 %v4023_v13  ;;  %v735_v19 = vadd.f32 %v4594_v2, %v641_v16 }
 0x190   : > { %v4020_v20 = vmul.f32 -1.442695, %v750_v15 }
 0x191   : > { %v4005_v23 = vmul.f32 -1.442695, %v735_v19  ;;  %v647_v24 = vpop.xlane.xlu1 %646 }
 0x192   : > { %4163 = vpow2.f32 %v4020_v20  ;;  %v737_v25 = vadd.f32 %v4594_v2, %v647_v24  ;;  %v689_v27 = vpop.xlane.xlu0 %688 }
 0x193   : > { %4165 = vpow2.f32 %v4005_v23  ;;  %v751_v29 = vadd.f32 %v4594_v2, %v689_v27 }
 0x194   : > { %v4156_v30 = vpop.eup %4155  ;;  %v4007_v31 = vmul.f32 -1.442695, %v737_v25 }
 0x195   : > { %v4158_v28 = vpop.eup %4157  ;;  %v864_v32 = vadd.f32 1.0, %v4156_v30  ;;  %v4021_v33 = vmul.f32 -1.442695, %v751_v29  ;;  %v704_v34 = vpop.xlane.xlu1 %703 }
 0x196   : > { %v862_v35 = vadd.f32 1.0, %v4158_v28  ;;  %4167 = vpow2.f32 %v4007_v31  ;;  %v756_v36 = vadd.f32 %v4594_v2, %v704_v34  ;;  %v656_v37 = vpop.xlane.xlu0 %655 }
 0x197   : > { %4169 = vrcp.f32 %v864_v32  ;;  %v740_v38 = vadd.f32 %v4594_v2, %v656_v37 }
 0x198   : > { %v4160_v39 = vpop.eup %4159  ;;  %4171 = vrcp.f32 %v862_v35  ;;  %v4026_v40 = vmul.f32 -1.442695, %v756_v36 }
 0x199   : > { %v4162_v41 = vpop.eup %4161  ;;  %v880_v42 = vadd.f32 1.0, %v4160_v39  ;;  %4173 = vpow2.f32 %v4021_v33  ;;  %v4010_v43 = vmul.f32 -1.442695, %v740_v38  ;;  %v698_v44 = vpop.xlane.xlu1 %697 }
 0x19a   : > { %v881_v47 = vadd.f32 1.0, %v4162_v41  ;;  %4175 = vpow2.f32 %v4026_v40  ;;  %v754_v48 = vadd.f32 %v4594_v2, %v698_v44  ;;  %v650_v50 = vpop.xlane.xlu0 %649 }
 0x19b   : > { %4177 = vrcp.f32 %v880_v42  ;;  %v738_v51 = vadd.f32 %v4594_v2, %v650_v50 }
 0x19c   : > { %v4164_v52 = vpop.eup %4163  ;;  %4179 = vrcp.f32 %v881_v47  ;;  %v4024_v53 = vmul.f32 -1.442695, %v754_v48 }
 0x19d   : > { %v4166_v57 = vpop.eup %4165  ;;  %v878_v55 = vadd.f32 1.0, %v4164_v52  ;;  %4181 = vpow2.f32 %v4010_v43  ;;  %v4008_v58 = vmul.f32 -1.442695, %v738_v51  ;;  %v707_v59 = vpop.xlane.xlu1 %706 }
 0x19e   : > { %v863_v22 = vadd.f32 1.0, %v4166_v57  ;;  %4183 = vpow2.f32 %v4024_v53  ;;  %v757_v49 = vadd.f32 %v4594_v2, %v707_v59  ;;  %v659_v61 = vpop.xlane.xlu0 %658 }
 0x19f   : > { %4185 = vrcp.f32 %v878_v55  ;;  %v741_v63 = vadd.f32 %v4594_v2, %v659_v61 }
 0x1a0   : > { %v4168_v3 = vpop.eup %4167  ;;  %4187 = vrcp.f32 %v863_v22  ;;  %v4027_v4 = vmul.f32 -1.442695, %v757_v49 }
 0x1a1   : > { %v4170_v6 = vpop.eup %4169  ;;  %v865_v7 = vadd.f32 1.0, %v4168_v3  ;;  %4189 = vpow2.f32 %v4008_v58  ;;  %v4011_v8 = vmul.f32 -1.442695, %v741_v63  ;;  %v701_v9 = vpop.xlane.xlu1 %700 }
 0x1a2   : > { %v4634_v11 = vpop.eup %4171  ;;  %4191 = vpow2.f32 %v4027_v4  ;;  %v755_v12 = vadd.f32 %v4594_v2, %v701_v9  ;;  %v653_v13 = vpop.xlane.xlu0 %652  ;;  %v1057_v14 = vrot.slane %v4170_v6, %v4479_v21  ;;  %v1061_v15 = vrot.slane %v4170_v6, %v4609_v54 }
 0x1a3   : > { %v4174_v16 = vpop.eup %4173  ;;  %4193 = vrcp.f32 %v865_v7  ;;  %v739_v19 = vadd.f32 %v4594_v2, %v653_v13  ;;  %v1065_v20 = vrot.slane %v4170_v6, %v4612_v56  ;;  %v1069_v23 = vrot.slane %v4170_v6, %v4616_v62 }
 0x1a4   : > { %v4176_v24 = vpop.eup %4175  ;;  %v879_v25 = vadd.f32 1.0, %v4174_v16  ;;  %4195 = vpow2.f32 %v4011_v8  ;;  %v4025_v27 = vmul.f32 -1.442695, %v755_v12  ;;  %v1073_v29 = vrot.slane %v4170_v6, %v4620_v0 }
 0x1a5   : > { %v4643_v30 = vpop.eup %4177  ;;  %v884_v31 = vadd.f32 1.0, %v4176_v24  ;;  %v4009_v28 = vmul.f32 -1.442695, %v739_v19  ;;  %v716_v32 = vpop.xlane.xlu1 %715  ;;  %v1077_v33 = vrot.slane %v4170_v6, %v4623_v1  ;;  %v1081_v34 = vrot.slane %v4170_v6, %v4626_v5 }
 0x1a6   : > { %v4647_v35 = vpop.eup %4179  ;;  %4197 = vrcp.f32 %v879_v25  ;;  %v760_v36 = vadd.f32 %v4594_v2, %v716_v32  ;;  %v668_v37 = vpop.xlane.xlu0 %667  ;;  %v1085_v38 = vrot.slane %v4170_v6, %v4629_v26  ;;  %v2112_v39 = vcombine.low %v1057_v14, %v1061_v15 }
 0x1a7   : > { %v4182_v40 = vpop.eup %4181  ;;  %4199 = vrcp.f32 %v884_v31  ;;  %v744_v41 = vadd.f32 %v4594_v2, %v668_v37  ;;  %v2113_v42 = vcombine.low %v1065_v20, %v1069_v23  ;;  %v2114_v43 = vcombine.low %v1073_v29, %v1077_v33 }
 0x1a8   : > { %v4184_v44 = vpop.eup %4183  ;;  %v868_v45 = vadd.f32 1.0, %v4182_v40  ;;  %4201 = vpow2.f32 %v4025_v27  ;;  %v4030_v46 = vmul.f32 -1.442695, %v760_v36  ;;  %v2115_v47 = vcombine.low %v1081_v34, %v1085_v38 }
 0x1a9   : > { %v4652_v48 = vpop.eup %4185  ;;  %v882_v50 = vadd.f32 1.0, %v4184_v44  ;;  %4203 = vpow2.f32 %v4009_v28  ;;  %v4014_v51 = vmul.f32 -1.442695, %v744_v41  ;;  %v710_v52 = vpop.xlane.xlu1 %709  ;;  %v2122_v53 = vrot.slane %v2112_v39, %v4632_v10 }
 0x1aa   : > { %v4655_v57 = vpop.eup %4187  ;;  %4205 = vrcp.f32 %v868_v45  ;;  %v758_v55 = vadd.f32 %v4594_v2, %v710_v52  ;;  %v662_v58 = vpop.xlane.xlu0 %661  ;;  %v2129_v59 = vrot.slane %v2113_v42, %v4632_v10  ;;  %v2136_v60 = vrot.slane %v2114_v43, %v4632_v10 }
 0x1ab   : > { %v4190_v22 = vpop.eup %4189  ;;  %4207 = vrcp.f32 %v882_v50  ;;  %v742_v49 = vadd.f32 %v4594_v2, %v662_v58  ;;  %v2143_v61 = vrot.slane %v2115_v47, %v4632_v10  ;;  %v993_v63 = vrot.slane %v4634_v11, %v4479_v21 }
 0x1ac   : > { %v4192_v3 = vpop.eup %4191  ;;  %v866_v4 = vadd.f32 1.0, %v4190_v22  ;;  %4209 = vpow2.f32 %v4030_v46  ;;  %v4028_v6 = vmul.f32 -1.442695, %v758_v55  ;;  %v2144_v7 = vcombine.low %v2122_v53, %v2129_v59 }
 0x1ad   : > { %v4664_v8 = vpop.eup %4193  ;;  %v885_v9 = vadd.f32 1.0, %v4192_v3  ;;  %4211 = vpow2.f32 %v4014_v51  ;;  %v4012_v12 = vmul.f32 -1.442695, %v742_v49  ;;  %v719_v13 = vpop.xlane.xlu1 %718  ;;  %v2145_v14 = vcombine.low %v2136_v60, %v2143_v61 }
 0x1ae   : > { %v4196_v15 = vpop.eup %4195  ;;  %4213 = vrcp.f32 %v866_v4  ;;  %v761_v16 = vadd.f32 %v4594_v2, %v719_v13  ;;  %v2152_v19 = vrot.slane %v2144_v7, %v4632_v10  ;;  %v671_v20 = vpop.xlane.xlu0 %670  ;;  %v997_v23 = vrot.slane %v4634_v11, %v4609_v54 }
 0x1af   : > { %4215 = vrcp.f32 %v885_v9  ;;  %v869_v24 = vadd.f32 1.0, %v4196_v15  ;;  %v2159_v25 = vrot.slane %v2145_v14, %v4632_v10  ;;  %v745_v27 = vadd.f32 %v4594_v2, %v671_v20 }
 0x1b0   : > { %v4672_v29 = vpop.eup %4197  ;;  %4217 = vpow2.f32 %v4028_v6  ;;  %v4031_v31 = vmul.f32 -1.442695, %v761_v16  ;;  %v1001_v28 = vrot.slane %v4634_v11, %v4612_v56  ;;  %v1005_v32 = vrot.slane %v4634_v11, %v4616_v62 }
 0x1b1   : > { %v4678_v33 = vpop.eup %4199  ;;  %4219 = vrcp.f32 %v869_v24  ;;  %v2160_v34 = vcombine.low %v2152_v19, %v2159_v25  ;;  %v4015_v36 = vmul.f32 -1.442695, %v745_v27  ;;  %v1009_v37 = vrot.slane %v4634_v11, %v4620_v0  ;;  %v713_v42 = vpop.xlane.xlu1 %712 }
 0x1b2   : > { %v4202_v38 = vpop.eup %4201  ;;  %4221 = vpow2.f32 %v4012_v12  ;;  %v1013_v39 = vrot.slane %v4634_v11, %v4623_v1  ;;  %v1017_v40 = vrot.slane %v4634_v11, %v4626_v5  ;;  %v1021_v41 = vrot.slane %v4634_v11, %v4629_v26 }
 0x1b3   : > { %v4204_v43 = vpop.eup %4203  ;;  %v883_v44 = vadd.f32 1.0, %v4202_v38  ;;  %4223 = vpow2.f32 %v4031_v31  ;;  %3589 = vperm.xlu1 %4136, %v2160_v34   ;;  %v2014_v45 = vcombine.low %v993_v63, %v997_v23  ;;  %v2015_v46 = vcombine.low %v1001_v28, %v1005_v32  ;;  %v665_v23 = vpop.xlane.xlu0 %664 }
 0x1b4   : > { %v4688_v47 = vpop.eup %4205  ;;  %v867_v50 = vadd.f32 1.0, %v4204_v43  ;;  %4225 = vpow2.f32 %v4015_v36  ;;  %v2016_v51 = vcombine.low %v1009_v37, %v1013_v39  ;;  %v2017_v52 = vcombine.low %v1017_v40, %v1021_v41 }
 0x1b5   : > { %v4690_v53 = vpop.eup %4207  ;;  %4227 = vrcp.f32 %v883_v44  ;;  %v2024_v55 = vrot.slane %v2014_v45, %v4632_v10  ;;  %v2031_v11 = vrot.slane %v2015_v46, %v4632_v10  ;;  %v759_v58 = vadd.f32 %v4594_v2, %v713_v42 }
 0x1b6   : > { %v4210_v59 = vpop.eup %4209  ;;  %4229 = vrcp.f32 %v867_v50  ;;  %v2038_v60 = vrot.slane %v2016_v51, %v4632_v10  ;;  %v2045_v22 = vrot.slane %v2017_v52, %v4632_v10  ;;  %v1569_v49 = vrot.slane %v4643_v30, %v4479_v21 }
 0x1b7   : > { %v4212_v61 = vpop.eup %4211  ;;  %v888_v63 = vadd.f32 1.0, %v4210_v59  ;;  %v2046_v3 = vcombine.low %v2024_v55, %v2031_v11  ;;  %v4029_v4 = vmul.f32 -1.442695, %v759_v58  ;;  %v1573_v6 = vrot.slane %v4643_v30, %v4609_v54 }
 0x1b8   : > { %v4701_v7 = vpop.eup %4213  ;;  %v872_v9 = vadd.f32 1.0, %v4212_v61  ;;  %v2047_v12 = vcombine.low %v2038_v60, %v2045_v22  ;;  %v1577_v13 = vrot.slane %v4643_v30, %v4612_v56  ;;  %v1581_v14 = vrot.slane %v4643_v30, %v4616_v62 }
 0x1b9   : > { %v4707_v15 = vpop.eup %4215  ;;  %4231 = vrcp.f32 %v888_v63  ;;  %v2054_v16 = vrot.slane %v2046_v3, %v4632_v10  ;;  %v1585_v19 = vrot.slane %v4643_v30, %v4620_v0  ;;  %v1589_v20 = vrot.slane %v4643_v30, %v4623_v1 }
 0x1ba   : > { %v4218_v24 = vpop.eup %4217  ;;  %4233 = vrcp.f32 %v872_v9  ;;  %v2061_v25 = vrot.slane %v2047_v12, %v4632_v10  ;;  %v1593_v27 = vrot.slane %v4643_v30, %v4626_v5  ;;  %v1597_v31 = vrot.slane %v4643_v30, %v4629_v26 }
 0x1bb   : > { %v4719_v28 = vpop.eup %4219  ;;  %v886_v32 = vadd.f32 1.0, %v4218_v24  ;;  %4235 = vpow2.f32 %v4029_v4  ;;  %v2896_v34 = vcombine.low %v1569_v49, %v1573_v6  ;;  %v2897_v36 = vcombine.low %v1577_v13, %v1581_v14  ;;  %v728_v13 = vpop.xlane.xlu1 %727 }
 0x1bc   : > { %v4222_v37 = vpop.eup %4221  ;;  %v2062_v38 = vcombine.low %v2054_v16, %v2061_v25  ;;  %v2898_v39 = vcombine.low %v1585_v19, %v1589_v20  ;;  %v2899_v40 = vcombine.low %v1593_v27, %v1597_v31  ;;  %v743_v41 = vadd.f32 %v4594_v2, %v665_v23 }
 0x1bd   : > { %v4224_v42 = vpop.eup %4223  ;;  %4237 = vrcp.f32 %v886_v32  ;;  %v870_v43 = vadd.f32 1.0, %v4222_v37  ;;  %v2906_v44 = vrot.slane %v2896_v34, %v4632_v10  ;;  %v2913_v45 = vrot.slane %v2897_v36, %v4632_v10 }
 0x1be   : > { %v4226_v30 = vpop.eup %4225  ;;  %v889_v46 = vadd.f32 1.0, %v4224_v42  ;;  %3583 = vperm.xlu0 %4137, %v2062_v38   ;;  %v2920_v50 = vrot.slane %v2898_v39, %v4632_v10  ;;  %v2927_v51 = vrot.slane %v2899_v40, %v4632_v10  ;;  %v4013_v52 = vmul.f32 -1.442695, %v743_v41 }
 0x1bf   : > { %v4726_v55 = vpop.eup %4227  ;;  %4239 = vrcp.f32 %v870_v43  ;;  %v873_v11 = vadd.f32 1.0, %v4226_v30  ;;  %v2928_v58 = vcombine.low %v2906_v44, %v2913_v45  ;;  %v1601_v59 = vrot.slane %v4647_v35, %v4479_v21 }
 0x1c0   : > { %v4730_v60 = vpop.eup %4229  ;;  %4241 = vrcp.f32 %v889_v46  ;;  %v2929_v22 = vcombine.low %v2920_v50, %v2927_v51  ;;  %v1605_v49 = vrot.slane %v4647_v35, %v4609_v54  ;;  %v1609_v61 = vrot.slane %v4647_v35, %v4612_v56 }
 0x1c1   : > { %4243 = vrcp.f32 %v873_v11  ;;  %v2936_v63 = vrot.slane %v2928_v58, %v4632_v10  ;;  %v1613_v3 = vrot.slane %v4647_v35, %v4616_v62  ;;  %v1617_v4 = vrot.slane %v4647_v35, %v4620_v0 }
 0x1c2   : > { %v2943_v6 = vrot.slane %v2929_v22, %v4632_v10  ;;  %4245 = vpow2.f32 %v4013_v52  ;;  %v1621_v9 = vrot.slane %v4647_v35, %v4623_v1  ;;  %v1625_v12 = vrot.slane %v4647_v35, %v4626_v5 }
 0x1c3   : > { %v4746_v14 = vpop.eup %4231  ;;  %v1629_v16 = vrot.slane %v4647_v35, %v4629_v26  ;;  %v2945_v19 = vcombine.low %v1601_v59, %v1605_v49  ;;  %v2946_v20 = vcombine.low %v1609_v61, %v1613_v3  ;;  %v764_v23 = vadd.f32 %v4594_v2, %v728_v13  ;;  %v680_v49 = vpop.xlane.xlu0 %679 }
 0x1c4   : > { %v4751_v24 = vpop.eup %4233  ;;  %v2944_v25 = vcombine.low %v2936_v63, %v2943_v6  ;;  %v2947_v27 = vcombine.low %v1617_v4, %v1621_v9  ;;  %v1505_v31 = vrot.slane %v4652_v48, %v4479_v21  ;;  %v1509_v32 = vrot.slane %v4652_v48, %v4609_v54  ;;  %v722_v61 = vpop.xlane.xlu1 %721 }
 0x1c5   : > { %v4236_v34 = vpop.eup %4235  ;;  %v2948_v36 = vcombine.low %v1625_v12, %v1629_v16  ;;  %v2955_v37 = vrot.slane %v2945_v19, %v4632_v10  ;;  %v2962_v35 = vrot.slane %v2946_v20, %v4632_v10  ;;  %v4034_v38 = vmul.f32 -1.442695, %v764_v23 }
 0x1c6   : > { %v887_v39 = vadd.f32 1.0, %v4236_v34  ;;  %3637 = vperm.xlu1 %4136, %v2944_v25   ;;  %v2969_v40 = vrot.slane %v2947_v27, %v4632_v10  ;;  %v1513_v41 = vrot.slane %v4652_v48, %v4612_v56  ;;  %v1517_v42 = vrot.slane %v4652_v48, %v4616_v62 }
 0x1c7   : > { %v4764_v43 = vpop.eup %4237  ;;  %v2976_v44 = vrot.slane %v2948_v36, %v4632_v10  ;;  %v2977_v45 = vcombine.low %v2955_v37, %v2962_v35  ;;  %4247 = vpow2.f32 %v4034_v38  ;;  %v1521_v30 = vrot.slane %v4652_v48, %v4620_v0 }
 0x1c8   : > { %4249 = vrcp.f32 %v887_v39  ;;  %v1525_v46 = vrot.slane %v4652_v48, %v4623_v1  ;;  %v1529_v50 = vrot.slane %v4652_v48, %v4626_v5  ;;  %v1533_v51 = vrot.slane %v4652_v48, %v4629_v26 }
 0x1c9   : > { %v4775_v52 = vpop.eup %4239  ;;  %v2978_v11 = vcombine.low %v2969_v40, %v2976_v44  ;;  %v2985_v58 = vrot.slane %v2977_v45, %v4632_v10  ;;  %v2798_v59 = vcombine.low %v1505_v31, %v1509_v32  ;;  %v2799_v22 = vcombine.low %v1513_v41, %v1517_v42 }
 0x1ca   : > { %v4778_v63 = vpop.eup %4241  ;;  %v2800_v3 = vcombine.low %v1521_v30, %v1525_v46  ;;  %v2801_v4 = vcombine.low %v1529_v50, %v1533_v51  ;;  %v748_v6 = vadd.f32 %v4594_v2, %v680_v49  ;;  %v762_v9 = vadd.f32 %v4594_v2, %v722_v61  ;;  %v674_v46 = vpop.xlane.xlu0 %673 }
 0x1cb   : > { %v4782_v12 = vpop.eup %4243  ;;  %v2992_v48 = vrot.slane %v2978_v11, %v4632_v10  ;;  %v2808_v13 = vrot.slane %v2798_v59, %v4632_v10  ;;  %v2815_v16 = vrot.slane %v2799_v22, %v4632_v10  ;;  %v1089_v19 = vrot.slane %v4664_v8, %v4479_v21 }
 0x1cc   : > { %v4246_v20 = vpop.eup %4245  ;;  %v2822_v23 = vrot.slane %v2800_v3, %v4632_v10  ;;  %v2829_v25 = vrot.slane %v2801_v4, %v4632_v10  ;;  %v4018_v27 = vmul.f32 -1.442695, %v748_v6  ;;  %v4032_v31 = vmul.f32 -1.442695, %v762_v9 }
 0x1cd   : > { %v871_v32 = vadd.f32 1.0, %v4246_v20  ;;  %v2993_v34 = vcombine.low %v2985_v58, %v2992_v48  ;;  %v2830_v36 = vcombine.low %v2808_v13, %v2815_v16  ;;  %v1093_v37 = vrot.slane %v4664_v8, %v4609_v54 }
 0x1ce   : > { %v2831_v35 = vcombine.low %v2822_v23, %v2829_v25  ;;  %4251 = vpow2.f32 %v4018_v27  ;;  %v1097_v38 = vrot.slane %v4664_v8, %v4612_v56  ;;  %v1101_v39 = vrot.slane %v4664_v8, %v4616_v62 }
 0x1cf   : > { %4253 = vrcp.f32 %v871_v32  ;;  %3640 = vperm.xlu0 %4137, %v2993_v34   ;;  %v2838_v40 = vrot.slane %v2830_v36, %v4632_v10  ;;  %v1105_v41 = vrot.slane %v4664_v8, %v4620_v0  ;;  %v1109_v42 = vrot.slane %v4664_v8, %v4623_v1  ;;  %v725_v36 = vpop.xlane.xlu1 %724 }
 0x1d0   : > { %v2845_v44 = vrot.slane %v2831_v35, %v4632_v10  ;;  %4255 = vpow2.f32 %v4032_v31  ;;  %v1113_v45 = vrot.slane %v4664_v8, %v4626_v5  ;;  %v1117_v30 = vrot.slane %v4664_v8, %v4629_v26 }
 0x1d1   : > { %v4248_v50 = vpop.eup %4247  ;;  %v2161_v51 = vcombine.low %v1089_v19, %v1093_v37  ;;  %v2162_v11 = vcombine.low %v1097_v38, %v1101_v39  ;;  %v2163_v58 = vcombine.low %v1105_v41, %v1109_v42  ;;  %v746_v59 = vadd.f32 %v4594_v2, %v674_v46 }
 0x1d2   : > { %v4808_v22 = vpop.eup %4249  ;;  %v892_v49 = vadd.f32 1.0, %v4248_v50  ;;  %v2846_v61 = vcombine.low %v2838_v40, %v2845_v44  ;;  %v2164_v3 = vcombine.low %v1113_v45, %v1117_v30  ;;  %v1537_v4 = vrot.slane %v4672_v29, %v4479_v21 }
 0x1d3   : > { %v2171_v6 = vrot.slane %v2161_v51, %v4632_v10  ;;  %v2178_v9 = vrot.slane %v2162_v11, %v4632_v10  ;;  %v2185_v8 = vrot.slane %v2163_v58, %v4632_v10  ;;  %v4016_v48 = vmul.f32 -1.442695, %v746_v59 }
 0x1d4   : > { %4257 = vrcp.f32 %v892_v49  ;;  %3631 = vperm.xlu1 %4136, %v2846_v61   ;;  %v2192_v13 = vrot.slane %v2164_v3, %v4632_v10  ;;  %v1541_v16 = vrot.slane %v4672_v29, %v4609_v54  ;;  %v1545_v19 = vrot.slane %v4672_v29, %v4612_v56 }
 0x1d5   : > { %v2193_v20 = vcombine.low %v2171_v6, %v2178_v9  ;;  %4259 = vpow2.f32 %v4016_v48  ;;  %v1549_v23 = vrot.slane %v4672_v29, %v4616_v62  ;;  %v1553_v25 = vrot.slane %v4672_v29, %v4620_v0 }
 0x1d6   : > { %v2194_v27 = vcombine.low %v2185_v8, %v2192_v13  ;;  %v1557_v31 = vrot.slane %v4672_v29, %v4623_v1  ;;  %v1561_v32 = vrot.slane %v4672_v29, %v4626_v5  ;;  %v1565_v34 = vrot.slane %v4672_v29, %v4629_v26  ;;  %v731_v13 = vpop.xlane.xlu1 %730 }
 0x1d7   : > { %v2201_v37 = vrot.slane %v2193_v20, %v4632_v10  ;;  %v2847_v35 = vcombine.low %v1537_v4, %v1541_v16  ;;  %v2848_v38 = vcombine.low %v1545_v19, %v1549_v23  ;;  %v763_v39 = vadd.f32 %v4594_v2, %v725_v36  ;;  %v677_v23 = vpop.xlane.xlu0 %676 }
 0x1d8   : > { %v4252_v40 = vpop.eup %4251  ;;  %v2208_v41 = vrot.slane %v2194_v27, %v4632_v10  ;;  %v2849_v42 = vcombine.low %v1553_v25, %v1557_v31  ;;  %v2850_v44 = vcombine.low %v1561_v32, %v1565_v34  ;;  %v1025_v45 = vrot.slane %v4655_v57, %v4479_v21 }
 0x1d9   : > { %v4835_v30 = vpop.eup %4253  ;;  %v876_v46 = vadd.f32 1.0, %v4252_v40  ;;  %v2857_v29 = vrot.slane %v2847_v35, %v4632_v10  ;;  %v2864_v50 = vrot.slane %v2848_v38, %v4632_v10  ;;  %v4033_v51 = vmul.f32 -1.442695, %v763_v39 }
 0x1da   : > { %v4256_v11 = vpop.eup %4255  ;;  %v2209_v58 = vcombine.low %v2201_v37, %v2208_v41  ;;  %v2871_v59 = vrot.slane %v2849_v42, %v4632_v10  ;;  %v2878_v49 = vrot.slane %v2850_v44, %v4632_v10  ;;  %v1029_v61 = vrot.slane %v4655_v57, %v4609_v54 }
 0x1db   : > { %4261 = vrcp.f32 %v876_v46  ;;  %v890_v3 = vadd.f32 1.0, %v4256_v11  ;;  %v2879_v4 = vcombine.low %v2857_v29, %v2864_v50  ;;  %v1033_v6 = vrot.slane %v4655_v57, %v4612_v56 }
 0x1dc   : > { %3592 = vperm.xlu1 %4136, %v2209_v58   ;;  %v2880_v9 = vcombine.low %v2871_v59, %v2878_v49  ;;  %4263 = vpow2.f32 %v4033_v51  ;;  %v1037_v8 = vrot.slane %v4655_v57, %v4616_v62  ;;  %v1041_v48 = vrot.slane %v4655_v57, %v4620_v0 }
 0x1dd   : > { %4265 = vrcp.f32 %v890_v3  ;;  %v2887_v16 = vrot.slane %v2879_v4, %v4632_v10  ;;  %v1045_v19 = vrot.slane %v4655_v57, %v4623_v1  ;;  %v1049_v20 = vrot.slane %v4655_v57, %v4626_v5 }
 0x1de   : > { %v4854_v25 = vpop.eup %4257  ;;  %v2894_v27 = vrot.slane %v2880_v9, %v4632_v10  ;;  %v1053_v31 = vrot.slane %v4655_v57, %v4629_v26  ;;  %v2063_v32 = vcombine.low %v1025_v45, %v1029_v61  ;;  %v2064_v34 = vcombine.low %v1033_v6, %v1037_v8  ;;  %v683_v61 = vpop.xlane.xlu0 %682 }
 0x1df   : > { %v4260_v36 = vpop.eup %4259  ;;  %v2065_v37 = vcombine.low %v1041_v48, %v1045_v19  ;;  %v747_v35 = vadd.f32 %v4594_v2, %v677_v23  ;;  %v765_v38 = vadd.f32 %v4594_v2, %v731_v13  ;;  %v1185_v39 = vrot.slane %v4688_v47, %v4479_v21 }
 0x1e0   : > { %v874_v40 = vadd.f32 1.0, %v4260_v36  ;;  %v2895_v41 = vcombine.low %v2887_v16, %v2894_v27  ;;  %v2066_v42 = vcombine.low %v1049_v20, %v1053_v31  ;;  %v2073_v44 = vrot.slane %v2063_v32, %v4632_v10 }
 0x1e1   : > { %v2080_v46 = vrot.slane %v2064_v34, %v4632_v10  ;;  %v2087_v57 = vrot.slane %v2065_v37, %v4632_v10  ;;  %v4017_v45 = vmul.f32 -1.442695, %v747_v35  ;;  %v4035_v29 = vmul.f32 -1.442695, %v765_v38 }
 0x1e2   : > { %4267 = vrcp.f32 %v874_v40  ;;  %3634 = vperm.xlu0 %4137, %v2895_v41   ;;  %v2094_v50 = vrot.slane %v2066_v42, %v4632_v10  ;;  %v1189_v51 = vrot.slane %v4688_v47, %v4609_v54  ;;  %v1193_v11 = vrot.slane %v4688_v47, %v4612_v56 }
 0x1e3   : > { %v2095_v58 = vcombine.low %v2073_v44, %v2080_v46  ;;  %4269 = vpow2.f32 %v4017_v45  ;;  %v1197_v59 = vrot.slane %v4688_v47, %v4616_v62  ;;  %v1201_v49 = vrot.slane %v4688_v47, %v4620_v0 }
 0x1e4   : > { %v2096_v3 = vcombine.low %v2087_v57, %v2094_v50  ;;  %4271 = vpow2.f32 %v4035_v29  ;;  %v1205_v4 = vrot.slane %v4688_v47, %v4623_v1  ;;  %v1209_v6 = vrot.slane %v4688_v47, %v4626_v5 }
 0x1e5   : > { %v4879_v9 = vpop.eup %4261  ;;  %v2103_v8 = vrot.slane %v2095_v58, %v4632_v10  ;;  %v1213_v48 = vrot.slane %v4688_v47, %v4629_v26  ;;  %v2308_v13 = vcombine.low %v1185_v39, %v1189_v51  ;;  %v2309_v16 = vcombine.low %v1193_v11, %v1197_v59 }
 0x1e6   : > { %v4264_v19 = vpop.eup %4263  ;;  %v2110_v20 = vrot.slane %v2096_v3, %v4632_v10  ;;  %v2310_v23 = vcombine.low %v1201_v49, %v1205_v4  ;;  %v749_v27 = vadd.f32 %v4594_v2, %v683_v61  ;;  %v1729_v31 = vrot.slane %v4707_v15, %v4479_v21 }
 0x1e7   : > { %v4888_v32 = vpop.eup %4265  ;;  %v891_v34 = vadd.f32 1.0, %v4264_v19  ;;  %v2311_v36 = vcombine.low %v1209_v6, %v1213_v48  ;;  %v2318_v37 = vrot.slane %v2308_v13, %v4632_v10  ;;  %v2325_v35 = vrot.slane %v2309_v16, %v4632_v10 }
 0x1e8   : > { %v2111_v47 = vcombine.low %v2103_v8, %v2110_v20  ;;  %v2332_v38 = vrot.slane %v2310_v23, %v4632_v10  ;;  %v4019_v39 = vmul.f32 -1.442695, %v749_v27  ;;  %v1733_v40 = vrot.slane %v4707_v15, %v4609_v54 }
 0x1e9   : > { %4273 = vrcp.f32 %v891_v34  ;;  %v2339_v2 = vrot.slane %v2311_v36, %v4632_v10  ;;  %v2340_v41 = vcombine.low %v2318_v37, %v2325_v35  ;;  %v1737_v42 = vrot.slane %v4707_v15, %v4612_v56 }
 0x1ea   : > { %3586 = vperm.xlu1 %4136, %v2111_v47   ;;  %4275 = vpow2.f32 %v4019_v39  ;;  %v1741_v44 = vrot.slane %v4707_v15, %v4616_v62  ;;  %v1745_v46 = vrot.slane %v4707_v15, %v4620_v0  ;;  %v1749_v57 = vrot.slane %v4707_v15, %v4623_v1 }
 0x1eb   : > { %v2341_v45 = vcombine.low %v2332_v38, %v2339_v2  ;;  %v2348_v29 = vrot.slane %v2340_v41, %v4632_v10  ;;  %v1753_v50 = vrot.slane %v4707_v15, %v4626_v5  ;;  %v1757_v51 = vrot.slane %v4707_v15, %v4629_v26 }
 0x1ec   : > { %v4909_v11 = vpop.eup %4267  ;;  %v3141_v58 = vcombine.low %v1729_v31, %v1733_v40  ;;  %v3142_v59 = vcombine.low %v1737_v42, %v1741_v44  ;;  %v3143_v49 = vcombine.low %v1745_v46, %v1749_v57  ;;  %v1697_v61 = vrot.slane %v4678_v33, %v4479_v21 }
 0x1ed   : > { %v4270_v3 = vpop.eup %4269  ;;  %v2355_v4 = vrot.slane %v2341_v45, %v4632_v10  ;;  %v3144_v6 = vcombine.low %v1753_v50, %v1757_v51  ;;  %v1701_v8 = vrot.slane %v4678_v33, %v4609_v54  ;;  %v1705_v48 = vrot.slane %v4678_v33, %v4612_v56 }
 0x1ee   : > { %v4272_v13 = vpop.eup %4271  ;;  %v875_v15 = vadd.f32 1.0, %v4270_v3  ;;  %v3151_v16 = vrot.slane %v3141_v58, %v4632_v10  ;;  %v3158_v19 = vrot.slane %v3142_v59, %v4632_v10  ;;  %v3165_v20 = vrot.slane %v3143_v49, %v4632_v10 }
 0x1ef   : > { %v893_v23 = vadd.f32 1.0, %v4272_v13  ;;  %v2356_v27 = vcombine.low %v2348_v29, %v2355_v4  ;;  %v3172_v31 = vrot.slane %v3144_v6, %v4632_v10  ;;  %v1709_v34 = vrot.slane %v4678_v33, %v4616_v62 }
 0x1f0   : > { %4277 = vrcp.f32 %v875_v15  ;;  %v3173_v36 = vcombine.low %v3151_v16, %v3158_v19  ;;  %v1713_v37 = vrot.slane %v4678_v33, %v4620_v0  ;;  %v1717_v35 = vrot.slane %v4678_v33, %v4623_v1 }
 0x1f1   : > { %4279 = vrcp.f32 %v893_v23  ;;  %3601 = vperm.xlu1 %4136, %v2356_v27   ;;  %v3174_v47 = vcombine.low %v3165_v20, %v3172_v31  ;;  %v1721_v38 = vrot.slane %v4678_v33, %v4626_v5  ;;  %v1725_v39 = vrot.slane %v4678_v33, %v4629_v26 }
 0x1f2   : > { %v3181_v40 = vrot.slane %v3173_v36, %v4632_v10  ;;  %v3092_v2 = vcombine.low %v1697_v61, %v1701_v8  ;;  %v3093_v41 = vcombine.low %v1705_v48, %v1709_v34  ;;  %v3094_v42 = vcombine.low %v1713_v37, %v1717_v35 }
 0x1f3   : > { %v4933_v44 = vpop.eup %4273  ;;  %v3188_v46 = vrot.slane %v3174_v47, %v4632_v10  ;;  %v3095_v57 = vcombine.low %v1721_v38, %v1725_v39  ;;  %v1665_v45 = vrot.slane %v4726_v55, %v4479_v21  ;;  %v1669_v29 = vrot.slane %v4726_v55, %v4609_v54 }
 0x1f4   : > { %v4276_v50 = vpop.eup %4275  ;;  %v3102_v51 = vrot.slane %v3092_v2, %v4632_v10  ;;  %v3109_v33 = vrot.slane %v3093_v41, %v4632_v10  ;;  %v3116_v58 = vrot.slane %v3094_v42, %v4632_v10  ;;  %v1673_v59 = vrot.slane %v4726_v55, %v4612_v56 }
 0x1f5   : > { %v877_v49 = vadd.f32 1.0, %v4276_v50  ;;  %v3189_v61 = vcombine.low %v3181_v40, %v3188_v46  ;;  %v3123_v3 = vrot.slane %v3095_v57, %v4632_v10  ;;  %v1677_v4 = vrot.slane %v4726_v55, %v4616_v62 }
 0x1f6   : > { %v3124_v6 = vcombine.low %v3102_v51, %v3109_v33  ;;  %v1681_v8 = vrot.slane %v4726_v55, %v4620_v0  ;;  %v1685_v48 = vrot.slane %v4726_v55, %v4623_v1  ;;  %v1689_v13 = vrot.slane %v4726_v55, %v4626_v5 }
 0x1f7   : > { %4281 = vrcp.f32 %v877_v49  ;;  %3652 = vperm.xlu0 %4137, %v3189_v61   ;;  %v3125_v15 = vcombine.low %v3116_v58, %v3123_v3  ;;  %v1693_v16 = vrot.slane %v4726_v55, %v4629_v26  ;;  %v3043_v19 = vcombine.low %v1665_v45, %v1669_v29 }
 0x1f8   : > { %v3132_v20 = vrot.slane %v3124_v6, %v4632_v10  ;;  %v3044_v23 = vcombine.low %v1673_v59, %v1677_v4  ;;  %v3045_v27 = vcombine.low %v1681_v8, %v1685_v48  ;;  %v1121_v31 = vrot.slane %v4701_v7, %v4479_v21 }
 0x1f9   : > { %v3139_v34 = vrot.slane %v3125_v15, %v4632_v10  ;;  %v3046_v36 = vcombine.low %v1689_v13, %v1693_v16  ;;  %v3053_v37 = vrot.slane %v3043_v19, %v4632_v10  ;;  %v1125_v35 = vrot.slane %v4701_v7, %v4609_v54 }
 0x1fa   : > { %v4963_v47 = vpop.eup %4277  ;;  %v3060_v55 = vrot.slane %v3044_v23, %v4632_v10  ;;  %v3067_v38 = vrot.slane %v3045_v27, %v4632_v10  ;;  %v1129_v39 = vrot.slane %v4701_v7, %v4612_v56  ;;  %v1133_v40 = vrot.slane %v4701_v7, %v4616_v62 }
 0x1fb   : > { %v4971_v2 = vpop.eup %4279  ;;  %v3140_v41 = vcombine.low %v3132_v20, %v3139_v34  ;;  %v3074_v42 = vrot.slane %v3046_v36, %v4632_v10  ;;  %v1137_v46 = vrot.slane %v4701_v7, %v4620_v0  ;;  %v1141_v57 = vrot.slane %v4701_v7, %v4623_v1 }
 0x1fc   : > { %v3075_v45 = vcombine.low %v3053_v37, %v3060_v55  ;;  %v1145_v29 = vrot.slane %v4701_v7, %v4626_v5  ;;  %v1149_v50 = vrot.slane %v4701_v7, %v4629_v26  ;;  %v2210_v51 = vcombine.low %v1121_v31, %v1125_v35 }
 0x1fd   : > { %3649 = vperm.xlu1 %4136, %v3140_v41   ;;  %v3076_v33 = vcombine.low %v3067_v38, %v3074_v42  ;;  %v2211_v58 = vcombine.low %v1129_v39, %v1133_v40  ;;  %v2212_v59 = vcombine.low %v1137_v46, %v1141_v57  ;;  %v1825_v49 = vrot.slane %v4746_v14, %v4479_v21 }
 0x1fe   : > { %v3083_v61 = vrot.slane %v3075_v45, %v4632_v10  ;;  %v2213_v3 = vcombine.low %v1145_v29, %v1149_v50  ;;  %v2220_v4 = vrot.slane %v2210_v51, %v4632_v10  ;;  %v1829_v6 = vrot.slane %v4746_v14, %v4609_v54 }
 0x1ff   : > { %v3090_v8 = vrot.slane %v3076_v33, %v4632_v10  ;;  %v2227_v7 = vrot.slane %v2211_v58, %v4632_v10  ;;  %v2234_v48 = vrot.slane %v2212_v59, %v4632_v10  ;;  %v1833_v13 = vrot.slane %v4746_v14, %v4612_v56 }
 0x200   : > { %v2241_v15 = vrot.slane %v2213_v3, %v4632_v10  ;;  %v1837_v16 = vrot.slane %v4746_v14, %v4616_v62  ;;  %v1841_v19 = vrot.slane %v4746_v14, %v4620_v0  ;;  %v1845_v20 = vrot.slane %v4746_v14, %v4623_v1 }
 0x201   : > { %v5000_v23 = vpop.eup %4281  ;;  %v3091_v27 = vcombine.low %v3083_v61, %v3090_v8  ;;  %v2242_v31 = vcombine.low %v2220_v4, %v2227_v7  ;;  %v1849_v34 = vrot.slane %v4746_v14, %v4626_v5  ;;  %v1853_v36 = vrot.slane %v4746_v14, %v4629_v26 }
 0x202   : > { %v2243_v37 = vcombine.low %v2234_v48, %v2241_v15  ;;  %v3288_v35 = vcombine.low %v1825_v49, %v1829_v6  ;;  %v3289_v55 = vcombine.low %v1833_v13, %v1837_v16  ;;  %v3290_v38 = vcombine.low %v1841_v19, %v1845_v20 }
 0x203   : > { %3646 = vperm.xlu0 %4137, %v3091_v27   ;;  %v2250_v39 = vrot.slane %v2242_v31, %v4632_v10  ;;  %v3291_v40 = vcombine.low %v1849_v34, %v1853_v36  ;;  %v1633_v41 = vrot.slane %v4690_v53, %v4479_v21  ;;  %v1637_v42 = vrot.slane %v4690_v53, %v4609_v54 }
 0x204   : > { %v2257_v46 = vrot.slane %v2243_v37, %v4632_v10  ;;  %v3298_v57 = vrot.slane %v3288_v35, %v4632_v10  ;;  %v3305_v14 = vrot.slane %v3289_v55, %v4632_v10  ;;  %v3312_v45 = vrot.slane %v3290_v38, %v4632_v10 }
 0x205   : > { %v3319_v29 = vrot.slane %v3291_v40, %v4632_v10  ;;  %v1641_v50 = vrot.slane %v4690_v53, %v4612_v56  ;;  %v1645_v51 = vrot.slane %v4690_v53, %v4616_v62  ;;  %v1649_v33 = vrot.slane %v4690_v53, %v4620_v0 }
 0x206   : > { %v2258_v58 = vcombine.low %v2250_v39, %v2257_v46  ;;  %v3320_v59 = vcombine.low %v3298_v57, %v3305_v14  ;;  %v1653_v49 = vrot.slane %v4690_v53, %v4623_v1  ;;  %v1657_v61 = vrot.slane %v4690_v53, %v4626_v5 }
 0x207   : > { %v3321_v3 = vcombine.low %v3312_v45, %v3319_v29  ;;  %v1661_v4 = vrot.slane %v4690_v53, %v4629_v26  ;;  %v2994_v6 = vcombine.low %v1633_v41, %v1637_v42  ;;  %v2995_v8 = vcombine.low %v1641_v50, %v1645_v51 }
 0x208   : > { %3595 = vperm.xlu1 %4136, %v2258_v58   ;;  %v3328_v7 = vrot.slane %v3320_v59, %v4632_v10  ;;  %v2996_v48 = vcombine.low %v1649_v33, %v1653_v49  ;;  %v1217_v13 = vrot.slane %v4719_v28, %v4479_v21  ;;  %v1221_v15 = vrot.slane %v4719_v28, %v4609_v54 }
 0x209   : > { %v3335_v16 = vrot.slane %v3321_v3, %v4632_v10  ;;  %v2997_v19 = vcombine.low %v1657_v61, %v1661_v4  ;;  %v3004_v20 = vrot.slane %v2994_v6, %v4632_v10  ;;  %v3011_v27 = vrot.slane %v2995_v8, %v4632_v10 }
 0x20a   : > { %v3018_v53 = vrot.slane %v2996_v48, %v4632_v10  ;;  %v1225_v31 = vrot.slane %v4719_v28, %v4612_v56  ;;  %v1229_v34 = vrot.slane %v4719_v28, %v4616_v62  ;;  %v1233_v36 = vrot.slane %v4719_v28, %v4620_v0 }
 0x20b   : > { %v3336_v37 = vcombine.low %v3328_v7, %v3335_v16  ;;  %v3025_v35 = vrot.slane %v2997_v19, %v4632_v10  ;;  %v3026_v55 = vcombine.low %v3004_v20, %v3011_v27  ;;  %v1237_v38 = vrot.slane %v4719_v28, %v4623_v1 }
 0x20c   : > { %v1241_v39 = vrot.slane %v4719_v28, %v4626_v5  ;;  %v1245_v40 = vrot.slane %v4719_v28, %v4629_v26  ;;  %v2357_v41 = vcombine.low %v1217_v13, %v1221_v15  ;;  %v2358_v42 = vcombine.low %v1225_v31, %v1229_v34 }
 0x20d   : > { %3661 = vperm.xlu0 %4137, %v3336_v37   ;;  %v3027_v46 = vcombine.low %v3018_v53, %v3025_v35  ;;  %v3034_v57 = vrot.slane %v3026_v55, %v4632_v10  ;;  %v2359_v14 = vcombine.low %v1233_v36, %v1237_v38  ;;  %v1857_v45 = vrot.slane %v4778_v63, %v4479_v21 }
 0x20e   : > { %v2360_v29 = vcombine.low %v1241_v39, %v1245_v40  ;;  %v2367_v50 = vrot.slane %v2357_v41, %v4632_v10  ;;  %v2374_v51 = vrot.slane %v2358_v42, %v4632_v10  ;;  %v1861_v33 = vrot.slane %v4778_v63, %v4609_v54 }
 0x20f   : > { %v3041_v28 = vrot.slane %v3027_v46, %v4632_v10  ;;  %v2381_v58 = vrot.slane %v2359_v14, %v4632_v10  ;;  %v1865_v59 = vrot.slane %v4778_v63, %v4612_v56  ;;  %v1869_v49 = vrot.slane %v4778_v63, %v4616_v62 }
 0x210   : > { %v2388_v61 = vrot.slane %v2360_v29, %v4632_v10  ;;  %v2389_v3 = vcombine.low %v2367_v50, %v2374_v51  ;;  %v1873_v4 = vrot.slane %v4778_v63, %v4620_v0  ;;  %v1877_v6 = vrot.slane %v4778_v63, %v4623_v1 }
 0x211   : > { %v3042_v8 = vcombine.low %v3034_v57, %v3041_v28  ;;  %v1881_v7 = vrot.slane %v4778_v63, %v4626_v5  ;;  %v1885_v48 = vrot.slane %v4778_v63, %v4629_v26  ;;  %v3337_v13 = vcombine.low %v1857_v45, %v1861_v33 }
 0x212   : > { %v2390_v15 = vcombine.low %v2381_v58, %v2388_v61  ;;  %v2397_v16 = vrot.slane %v2389_v3, %v4632_v10  ;;  %v3338_v19 = vcombine.low %v1865_v59, %v1869_v49  ;;  %v3339_v20 = vcombine.low %v1873_v4, %v1877_v6 }
 0x213   : > { %3643 = vperm.xlu1 %4136, %v3042_v8   ;;  %v3340_v27 = vcombine.low %v1881_v7, %v1885_v48  ;;  %v3347_v53 = vrot.slane %v3337_v13, %v4632_v10  ;;  %v1153_v31 = vrot.slane %v4730_v60, %v4479_v21  ;;  %v1157_v34 = vrot.slane %v4730_v60, %v4609_v54 }
 0x214   : > { %v2404_v36 = vrot.slane %v2390_v15, %v4632_v10  ;;  %v3354_v63 = vrot.slane %v3338_v19, %v4632_v10  ;;  %v3361_v37 = vrot.slane %v3339_v20, %v4632_v10  ;;  %v1161_v35 = vrot.slane %v4730_v60, %v4612_v56 }
 0x215   : > { %v3368_v55 = vrot.slane %v3340_v27, %v4632_v10  ;;  %v1165_v38 = vrot.slane %v4730_v60, %v4616_v62  ;;  %v1169_v39 = vrot.slane %v4730_v60, %v4620_v0  ;;  %v1173_v40 = vrot.slane %v4730_v60, %v4623_v1 }
 0x216   : > { %v2405_v41 = vcombine.low %v2397_v16, %v2404_v36  ;;  %v3369_v42 = vcombine.low %v3347_v53, %v3354_v63  ;;  %v1177_v46 = vrot.slane %v4730_v60, %v4626_v5  ;;  %v1181_v57 = vrot.slane %v4730_v60, %v4629_v26 }
 0x217   : > { %v3370_v14 = vcombine.low %v3361_v37, %v3368_v55  ;;  %v2259_v45 = vcombine.low %v1153_v31, %v1157_v34  ;;  %v2260_v29 = vcombine.low %v1161_v35, %v1165_v38  ;;  %v2261_v50 = vcombine.low %v1169_v39, %v1173_v40 }
 0x218   : > { %3604 = vperm.xlu1 %4136, %v2405_v41   ;;  %v3377_v51 = vrot.slane %v3369_v42, %v4632_v10  ;;  %v2262_v33 = vcombine.low %v1177_v46, %v1181_v57  ;;  %v1313_v28 = vrot.slane %v4751_v24, %v4479_v21  ;;  %v1317_v58 = vrot.slane %v4751_v24, %v4609_v54 }
 0x219   : > { %v3384_v59 = vrot.slane %v3370_v14, %v4632_v10  ;;  %v2269_v49 = vrot.slane %v2259_v45, %v4632_v10  ;;  %v2276_v60 = vrot.slane %v2260_v29, %v4632_v10  ;;  %v2283_v61 = vrot.slane %v2261_v50, %v4632_v10 }
 0x21a   : > { %v2290_v3 = vrot.slane %v2262_v33, %v4632_v10  ;;  %v1321_v4 = vrot.slane %v4751_v24, %v4612_v56  ;;  %v1325_v6 = vrot.slane %v4751_v24, %v4616_v62  ;;  %v1329_v8 = vrot.slane %v4751_v24, %v4620_v0 }
 0x21b   : > { %v3385_v7 = vcombine.low %v3377_v51, %v3384_v59  ;;  %v2291_v48 = vcombine.low %v2269_v49, %v2276_v60  ;;  %v1333_v13 = vrot.slane %v4751_v24, %v4623_v1  ;;  %v1337_v15 = vrot.slane %v4751_v24, %v4626_v5 }
 0x21c   : > { %v2292_v16 = vcombine.low %v2283_v61, %v2290_v3  ;;  %v1341_v19 = vrot.slane %v4751_v24, %v4629_v26  ;;  %v2504_v20 = vcombine.low %v1313_v28, %v1317_v58  ;;  %v2505_v27 = vcombine.low %v1321_v4, %v1325_v6 }
 0x21d   : > { %3664 = vperm.xlu0 %4137, %v3385_v7   ;;  %v2299_v53 = vrot.slane %v2291_v48, %v4632_v10  ;;  %v2506_v31 = vcombine.low %v1329_v8, %v1333_v13  ;;  %v1281_v34 = vrot.slane %v4835_v30, %v4479_v21  ;;  %v1285_v36 = vrot.slane %v4835_v30, %v4609_v54 }
 0x21e   : > { %v2306_v63 = vrot.slane %v2292_v16, %v4632_v10  ;;  %v2507_v37 = vcombine.low %v1337_v15, %v1341_v19  ;;  %v2514_v35 = vrot.slane %v2504_v20, %v4632_v10  ;;  %v2521_v55 = vrot.slane %v2505_v27, %v4632_v10 }
 0x21f   : > { %v2528_v24 = vrot.slane %v2506_v31, %v4632_v10  ;;  %v1289_v38 = vrot.slane %v4835_v30, %v4612_v56  ;;  %v1293_v39 = vrot.slane %v4835_v30, %v4616_v62  ;;  %v1297_v40 = vrot.slane %v4835_v30, %v4620_v0 }
 0x220   : > { %v2307_v41 = vcombine.low %v2299_v53, %v2306_v63  ;;  %v2535_v42 = vrot.slane %v2507_v37, %v4632_v10  ;;  %v2536_v46 = vcombine.low %v2514_v35, %v2521_v55  ;;  %v1301_v57 = vrot.slane %v4835_v30, %v4623_v1 }
 0x221   : > { %v1305_v14 = vrot.slane %v4835_v30, %v4626_v5  ;;  %v1309_v45 = vrot.slane %v4835_v30, %v4629_v26  ;;  %v2455_v29 = vcombine.low %v1281_v34, %v1285_v36  ;;  %v2456_v50 = vcombine.low %v1289_v38, %v1293_v39 }
 0x222   : > { %3598 = vperm.xlu1 %4136, %v2307_v41   ;;  %v2537_v51 = vcombine.low %v2528_v24, %v2535_v42  ;;  %v2544_v33 = vrot.slane %v2536_v46, %v4632_v10  ;;  %v2457_v28 = vcombine.low %v1297_v40, %v1301_v57  ;;  %v1249_v58 = vrot.slane %v4775_v52, %v4479_v21 }
 0x223   : > { %v2458_v59 = vcombine.low %v1305_v14, %v1309_v45  ;;  %v2465_v49 = vrot.slane %v2455_v29, %v4632_v10  ;;  %v2472_v60 = vrot.slane %v2456_v50, %v4632_v10  ;;  %v1253_v61 = vrot.slane %v4775_v52, %v4609_v54 }
 0x224   : > { %v2551_v30 = vrot.slane %v2537_v51, %v4632_v10  ;;  %v2479_v3 = vrot.slane %v2457_v28, %v4632_v10  ;;  %v1257_v4 = vrot.slane %v4775_v52, %v4612_v56  ;;  %v1261_v6 = vrot.slane %v4775_v52, %v4616_v62 }
 0x225   : > { %v2486_v8 = vrot.slane %v2458_v59, %v4632_v10  ;;  %v2487_v7 = vcombine.low %v2465_v49, %v2472_v60  ;;  %v1265_v48 = vrot.slane %v4775_v52, %v4620_v0  ;;  %v1269_v13 = vrot.slane %v4775_v52, %v4623_v1 }
 0x226   : > { %v2552_v15 = vcombine.low %v2544_v33, %v2551_v30  ;;  %v1273_v16 = vrot.slane %v4775_v52, %v4626_v5  ;;  %v1277_v19 = vrot.slane %v4775_v52, %v4629_v26  ;;  %v2406_v20 = vcombine.low %v1249_v58, %v1253_v61 }
 0x227   : > { %v2488_v27 = vcombine.low %v2479_v3, %v2486_v8  ;;  %v2495_v53 = vrot.slane %v2487_v7, %v4632_v10  ;;  %v2407_v31 = vcombine.low %v1257_v4, %v1261_v6  ;;  %v2408_v34 = vcombine.low %v1265_v48, %v1269_v13 }
 0x228   : > { %3613 = vperm.xlu1 %4136, %v2552_v15   ;;  %v2409_v36 = vcombine.low %v1273_v16, %v1277_v19  ;;  %v2416_v63 = vrot.slane %v2406_v20, %v4632_v10  ;;  %v1793_v37 = vrot.slane %v4808_v22, %v4479_v21  ;;  %v1797_v35 = vrot.slane %v4808_v22, %v4609_v54 }
 0x229   : > { %v2502_v55 = vrot.slane %v2488_v27, %v4632_v10  ;;  %v2423_v52 = vrot.slane %v2407_v31, %v4632_v10  ;;  %v2430_v24 = vrot.slane %v2408_v34, %v4632_v10  ;;  %v1801_v38 = vrot.slane %v4808_v22, %v4612_v56 }
 0x22a   : > { %v2437_v39 = vrot.slane %v2409_v36, %v4632_v10  ;;  %v1805_v40 = vrot.slane %v4808_v22, %v4616_v62  ;;  %v1809_v41 = vrot.slane %v4808_v22, %v4620_v0  ;;  %v1813_v42 = vrot.slane %v4808_v22, %v4623_v1 }
 0x22b   : > { %v2503_v46 = vcombine.low %v2495_v53, %v2502_v55  ;;  %v2438_v57 = vcombine.low %v2416_v63, %v2423_v52  ;;  %v1817_v14 = vrot.slane %v4808_v22, %v4626_v5  ;;  %v1821_v45 = vrot.slane %v4808_v22, %v4629_v26 }
 0x22c   : > { %v2439_v29 = vcombine.low %v2430_v24, %v2437_v39  ;;  %v3239_v50 = vcombine.low %v1793_v37, %v1797_v35  ;;  %v3240_v51 = vcombine.low %v1801_v38, %v1805_v40  ;;  %v3241_v33 = vcombine.low %v1809_v41, %v1813_v42 }
 0x22d   : > { %3610 = vperm.xlu0 %4137, %v2503_v46   ;;  %v2446_v28 = vrot.slane %v2438_v57, %v4632_v10  ;;  %v3242_v58 = vcombine.low %v1817_v14, %v1821_v45  ;;  %v1761_v59 = vrot.slane %v4764_v43, %v4479_v21  ;;  %v1765_v49 = vrot.slane %v4764_v43, %v4609_v54 }
 0x22e   : > { %v2453_v60 = vrot.slane %v2439_v29, %v4632_v10  ;;  %v3249_v61 = vrot.slane %v3239_v50, %v4632_v10  ;;  %v3256_v22 = vrot.slane %v3240_v51, %v4632_v10  ;;  %v3263_v30 = vrot.slane %v3241_v33, %v4632_v10 }
 0x22f   : > { %v3270_v3 = vrot.slane %v3242_v58, %v4632_v10  ;;  %v1769_v4 = vrot.slane %v4764_v43, %v4612_v56  ;;  %v1773_v6 = vrot.slane %v4764_v43, %v4616_v62  ;;  %v1777_v8 = vrot.slane %v4764_v43, %v4620_v0 }
 0x230   : > { %v2454_v7 = vcombine.low %v2446_v28, %v2453_v60  ;;  %v3271_v48 = vcombine.low %v3249_v61, %v3256_v22  ;;  %v1781_v13 = vrot.slane %v4764_v43, %v4623_v1  ;;  %v1785_v15 = vrot.slane %v4764_v43, %v4626_v5 }
 0x231   : > { %v3272_v16 = vcombine.low %v3263_v30, %v3270_v3  ;;  %v1789_v19 = vrot.slane %v4764_v43, %v4629_v26  ;;  %v3190_v20 = vcombine.low %v1761_v59, %v1765_v49  ;;  %v3191_v27 = vcombine.low %v1769_v4, %v1773_v6 }
 0x232   : > { %3607 = vperm.xlu1 %4136, %v2454_v7   ;;  %v3279_v53 = vrot.slane %v3271_v48, %v4632_v10  ;;  %v3192_v31 = vcombine.low %v1777_v8, %v1781_v13  ;;  %v1953_v34 = vrot.slane %v4854_v25, %v4479_v21  ;;  %v1957_v36 = vrot.slane %v4854_v25, %v4609_v54 }
 0x233   : > { %v3286_v63 = vrot.slane %v3272_v16, %v4632_v10  ;;  %v3193_v37 = vcombine.low %v1785_v15, %v1789_v19  ;;  %v3200_v35 = vrot.slane %v3190_v20, %v4632_v10  ;;  %v3207_v55 = vrot.slane %v3191_v27, %v4632_v10 }
 0x234   : > { %v3214_v43 = vrot.slane %v3192_v31, %v4632_v10  ;;  %v1961_v52 = vrot.slane %v4854_v25, %v4612_v56  ;;  %v1965_v24 = vrot.slane %v4854_v25, %v4616_v62  ;;  %v1969_v38 = vrot.slane %v4854_v25, %v4620_v0 }
 0x235   : > { %v3287_v39 = vcombine.low %v3279_v53, %v3286_v63  ;;  %v3221_v40 = vrot.slane %v3193_v37, %v4632_v10  ;;  %v3222_v41 = vcombine.low %v3200_v35, %v3207_v55  ;;  %v1973_v42 = vrot.slane %v4854_v25, %v4623_v1 }
 0x236   : > { %v1977_v46 = vrot.slane %v4854_v25, %v4626_v5  ;;  %v1981_v57 = vrot.slane %v4854_v25, %v4629_v26  ;;  %v3484_v14 = vcombine.low %v1953_v34, %v1957_v36  ;;  %v3485_v45 = vcombine.low %v1961_v52, %v1965_v24 }
 0x237   : > { %3658 = vperm.xlu0 %4137, %v3287_v39   ;;  %v3223_v29 = vcombine.low %v3214_v43, %v3221_v40  ;;  %v3230_v50 = vrot.slane %v3222_v41, %v4632_v10  ;;  %v3486_v51 = vcombine.low %v1969_v38, %v1973_v42  ;;  %v1345_v33 = vrot.slane %v4782_v12, %v4479_v21 }
 0x238   : > { %v3487_v28 = vcombine.low %v1977_v46, %v1981_v57  ;;  %v3494_v58 = vrot.slane %v3484_v14, %v4632_v10  ;;  %v3501_v59 = vrot.slane %v3485_v45, %v4632_v10  ;;  %v1349_v49 = vrot.slane %v4782_v12, %v4609_v54 }
 0x239   : > { %v3237_v25 = vrot.slane %v3223_v29, %v4632_v10  ;;  %v3508_v60 = vrot.slane %v3486_v51, %v4632_v10  ;;  %v1353_v61 = vrot.slane %v4782_v12, %v4612_v56  ;;  %v1357_v22 = vrot.slane %v4782_v12, %v4616_v62 }
 0x23a   : > { %v3515_v30 = vrot.slane %v3487_v28, %v4632_v10  ;;  %v3516_v3 = vcombine.low %v3494_v58, %v3501_v59  ;;  %v1361_v4 = vrot.slane %v4782_v12, %v4620_v0  ;;  %v1365_v6 = vrot.slane %v4782_v12, %v4623_v1 }
 0x23b   : > { %v3238_v8 = vcombine.low %v3230_v50, %v3237_v25  ;;  %v1369_v7 = vrot.slane %v4782_v12, %v4626_v5  ;;  %v1373_v48 = vrot.slane %v4782_v12, %v4629_v26  ;;  %v2553_v13 = vcombine.low %v1345_v33, %v1349_v49 }
 0x23c   : > { %v3517_v15 = vcombine.low %v3508_v60, %v3515_v30  ;;  %v3524_v16 = vrot.slane %v3516_v3, %v4632_v10  ;;  %v2554_v19 = vcombine.low %v1353_v61, %v1357_v22  ;;  %v2555_v20 = vcombine.low %v1361_v4, %v1365_v6 }
 0x23d   : > { %3655 = vperm.xlu1 %4136, %v3238_v8   ;;  %v2556_v27 = vcombine.low %v1369_v7, %v1373_v48  ;;  %v2563_v53 = vrot.slane %v2553_v13, %v4632_v10  ;;  %v1889_v31 = vrot.slane %v4888_v32, %v4479_v21  ;;  %v1893_v34 = vrot.slane %v4888_v32, %v4609_v54 }
 0x23e   : > { %v3531_v36 = vrot.slane %v3517_v15, %v4632_v10  ;;  %v2570_v12 = vrot.slane %v2554_v19, %v4632_v10  ;;  %v2577_v63 = vrot.slane %v2555_v20, %v4632_v10  ;;  %v1897_v37 = vrot.slane %v4888_v32, %v4612_v56 }
 0x23f   : > { %v2584_v35 = vrot.slane %v2556_v27, %v4632_v10  ;;  %v1901_v55 = vrot.slane %v4888_v32, %v4616_v62  ;;  %v1905_v43 = vrot.slane %v4888_v32, %v4620_v0  ;;  %v1909_v52 = vrot.slane %v4888_v32, %v4623_v1 }
 0x240   : > { %v3532_v24 = vcombine.low %v3524_v16, %v3531_v36  ;;  %v2585_v38 = vcombine.low %v2563_v53, %v2570_v12  ;;  %v1913_v39 = vrot.slane %v4888_v32, %v4626_v5  ;;  %v1917_v40 = vrot.slane %v4888_v32, %v4629_v26 }
 0x241   : > { %v2586_v41 = vcombine.low %v2577_v63, %v2584_v35  ;;  %v3386_v42 = vcombine.low %v1889_v31, %v1893_v34  ;;  %v3387_v46 = vcombine.low %v1897_v37, %v1901_v55  ;;  %v3388_v57 = vcombine.low %v1905_v43, %v1909_v52 }
 0x242   : > { %3673 = vperm.xlu0 %4137, %v3532_v24   ;;  %v2593_v14 = vrot.slane %v2585_v38, %v4632_v10  ;;  %v3389_v45 = vcombine.low %v1913_v39, %v1917_v40  ;;  %v1441_v29 = vrot.slane %v4879_v9, %v4479_v21  ;;  %v1445_v50 = vrot.slane %v4879_v9, %v4609_v54 }
 0x243   : > { %v2600_v51 = vrot.slane %v2586_v41, %v4632_v10  ;;  %v3396_v33 = vrot.slane %v3386_v42, %v4632_v10  ;;  %v3403_v32 = vrot.slane %v3387_v46, %v4632_v10  ;;  %v3410_v28 = vrot.slane %v3388_v57, %v4632_v10 }
 0x244   : > { %v3417_v58 = vrot.slane %v3389_v45, %v4632_v10  ;;  %v1449_v59 = vrot.slane %v4879_v9, %v4612_v56  ;;  %v1453_v49 = vrot.slane %v4879_v9, %v4616_v62  ;;  %v1457_v25 = vrot.slane %v4879_v9, %v4620_v0 }
 0x245   : > { %v2601_v60 = vcombine.low %v2593_v14, %v2600_v51  ;;  %v3418_v61 = vcombine.low %v3396_v33, %v3403_v32  ;;  %v1461_v22 = vrot.slane %v4879_v9, %v4623_v1  ;;  %v1465_v30 = vrot.slane %v4879_v9, %v4626_v5 }
 0x246   : > { %v3419_v3 = vcombine.low %v3410_v28, %v3417_v58  ;;  %v1469_v4 = vrot.slane %v4879_v9, %v4629_v26  ;;  %v2700_v6 = vcombine.low %v1441_v29, %v1445_v50  ;;  %v2701_v8 = vcombine.low %v1449_v59, %v1453_v49 }
 0x247   : > { %3616 = vperm.xlu1 %4136, %v2601_v60   ;;  %v3426_v7 = vrot.slane %v3418_v61, %v4632_v10  ;;  %v2702_v48 = vcombine.low %v1457_v25, %v1461_v22  ;;  %v1921_v13 = vrot.slane %v4933_v44, %v4479_v21  ;;  %v1925_v15 = vrot.slane %v4933_v44, %v4609_v54 }
 0x248   : > { %v3433_v16 = vrot.slane %v3419_v3, %v4632_v10  ;;  %v2703_v19 = vcombine.low %v1465_v30, %v1469_v4  ;;  %v2710_v20 = vrot.slane %v2700_v6, %v4632_v10  ;;  %v2717_v27 = vrot.slane %v2701_v8, %v4632_v10 }
 0x249   : > { %v2724_v9 = vrot.slane %v2702_v48, %v4632_v10  ;;  %v1929_v53 = vrot.slane %v4933_v44, %v4612_v56  ;;  %v1933_v31 = vrot.slane %v4933_v44, %v4616_v62  ;;  %v1937_v34 = vrot.slane %v4933_v44, %v4620_v0 }
 0x24a   : > { %v3434_v36 = vcombine.low %v3426_v7, %v3433_v16  ;;  %v2731_v12 = vrot.slane %v2703_v19, %v4632_v10  ;;  %v2732_v63 = vcombine.low %v2710_v20, %v2717_v27  ;;  %v1941_v37 = vrot.slane %v4933_v44, %v4623_v1 }
 0x24b   : > { %v1945_v35 = vrot.slane %v4933_v44, %v4626_v5  ;;  %v1949_v55 = vrot.slane %v4933_v44, %v4629_v26  ;;  %v3435_v43 = vcombine.low %v1921_v13, %v1925_v15  ;;  %v3436_v52 = vcombine.low %v1929_v53, %v1933_v31 }
 0x24c   : > { %3667 = vperm.xlu0 %4137, %v3434_v36   ;;  %v2733_v24 = vcombine.low %v2724_v9, %v2731_v12  ;;  %v2740_v38 = vrot.slane %v2732_v63, %v4632_v10  ;;  %v3437_v39 = vcombine.low %v1937_v34, %v1941_v37  ;;  %v1377_v40 = vrot.slane %v4909_v11, %v4479_v21 }
 0x24d   : > { %v3438_v41 = vcombine.low %v1945_v35, %v1949_v55  ;;  %v3445_v42 = vrot.slane %v3435_v43, %v4632_v10  ;;  %v3452_v46 = vrot.slane %v3436_v52, %v4632_v10  ;;  %v1381_v57 = vrot.slane %v4909_v11, %v4609_v54 }
 0x24e   : > { %v2747_v44 = vrot.slane %v2733_v24, %v4632_v10  ;;  %v3459_v14 = vrot.slane %v3437_v39, %v4632_v10  ;;  %v1385_v45 = vrot.slane %v4909_v11, %v4612_v56  ;;  %v1389_v29 = vrot.slane %v4909_v11, %v4616_v62 }
 0x24f   : > { %v3466_v50 = vrot.slane %v3438_v41, %v4632_v10  ;;  %v3467_v51 = vcombine.low %v3445_v42, %v3452_v46  ;;  %v1393_v33 = vrot.slane %v4909_v11, %v4620_v0  ;;  %v1397_v32 = vrot.slane %v4909_v11, %v4623_v1 }
 0x250   : > { %v2748_v28 = vcombine.low %v2740_v38, %v2747_v44  ;;  %v1401_v58 = vrot.slane %v4909_v11, %v4626_v5  ;;  %v1405_v59 = vrot.slane %v4909_v11, %v4629_v26  ;;  %v2602_v49 = vcombine.low %v1377_v40, %v1381_v57 }
 0x251   : > { %v3468_v25 = vcombine.low %v3459_v14, %v3466_v50  ;;  %v3475_v60 = vrot.slane %v3467_v51, %v4632_v10  ;;  %v2603_v61 = vcombine.low %v1385_v45, %v1389_v29  ;;  %v2604_v22 = vcombine.low %v1393_v33, %v1397_v32 }
 0x252   : > { %3625 = vperm.xlu1 %4136, %v2748_v28   ;;  %v2605_v30 = vcombine.low %v1401_v58, %v1405_v59  ;;  %v2612_v3 = vrot.slane %v2602_v49, %v4632_v10  ;;  %v1985_v4 = vrot.slane %v4971_v2, %v4479_v21  ;;  %v1989_v6 = vrot.slane %v4971_v2, %v4609_v54 }
 0x253   : > { %v3482_v8 = vrot.slane %v3468_v25, %v4632_v10  ;;  %v2619_v11 = vrot.slane %v2603_v61, %v4632_v10  ;;  %v2626_v7 = vrot.slane %v2604_v22, %v4632_v10  ;;  %v1993_v48 = vrot.slane %v4971_v2, %v4612_v56 }
 0x254   : > { %v2633_v13 = vrot.slane %v2605_v30, %v4632_v10  ;;  %v1997_v15 = vrot.slane %v4971_v2, %v4616_v62  ;;  %v2001_v16 = vrot.slane %v4971_v2, %v4620_v0  ;;  %v2005_v19 = vrot.slane %v4971_v2, %v4623_v1 }
 0x255   : > { %v3483_v20 = vcombine.low %v3475_v60, %v3482_v8  ;;  %v2634_v27 = vcombine.low %v2612_v3, %v2619_v11  ;;  %v2009_v9 = vrot.slane %v4971_v2, %v4626_v5  ;;  %v2013_v53 = vrot.slane %v4971_v2, %v4629_v26 }
 0x256   : > { %v2635_v31 = vcombine.low %v2626_v7, %v2633_v13  ;;  %v3533_v34 = vcombine.low %v1985_v4, %v1989_v6  ;;  %v3534_v36 = vcombine.low %v1993_v48, %v1997_v15  ;;  %v3535_v12 = vcombine.low %v2001_v16, %v2005_v19 }
 0x257   : > { %3670 = vperm.xlu0 %4137, %v3483_v20   ;;  %v2642_v63 = vrot.slane %v2634_v27, %v4632_v10  ;;  %v3536_v37 = vcombine.low %v2009_v9, %v2013_v53  ;;  %v1409_v35 = vrot.slane %v4963_v47, %v4479_v21  ;;  %v1413_v55 = vrot.slane %v4963_v47, %v4609_v54  ;;  %v3590_v9 = vpop.permute.xlu1 %3589 }
 0x258   : > { %v2649_v43 = vrot.slane %v2635_v31, %v4632_v10  ;;  %v3543_v52 = vrot.slane %v3533_v34, %v4632_v10  ;;  %v3550_v2 = vrot.slane %v3534_v36, %v4632_v10  ;;  %v3557_v24 = vrot.slane %v3535_v12, %v4632_v10 }
 0x259   : > { %v3564_v38 = vrot.slane %v3536_v37, %v4632_v10  ;;  %v1417_v39 = vrot.slane %v4963_v47, %v4612_v56  ;;  %v1421_v40 = vrot.slane %v4963_v47, %v4616_v62  ;;  %v1425_v41 = vrot.slane %v4963_v47, %v4620_v0  ;;  %v3584_v37 = vpop.permute.xlu0 %3583 }
 0x25a   : > { %v2650_v42 = vcombine.low %v2642_v63, %v2649_v43  ;;  %v3565_v46 = vcombine.low %v3543_v52, %v3550_v2  ;;  %v1429_v57 = vrot.slane %v4963_v47, %v4623_v1  ;;  %v1433_v44 = vrot.slane %v4963_v47, %v4626_v5 }
 0x25b   : > { %v3566_v14 = vcombine.low %v3557_v24, %v3564_v38  ;;  %v1437_v45 = vrot.slane %v4963_v47, %v4629_v26  ;;  %v2651_v29 = vcombine.low %v1409_v35, %v1413_v55  ;;  %v2652_v50 = vcombine.low %v1417_v39, %v1421_v40  ;;  %v3638_v53 = vpop.permute.xlu1 %3637 }
 0x25c   : > { %3619 = vperm.xlu1 %4136, %v2650_v42   ;;  %v3573_v51 = vrot.slane %v3565_v46, %v4632_v10  ;;  %v2653_v33 = vcombine.low %v1425_v41, %v1429_v57  ;;  %v1473_v32 = vrot.slane %v5000_v23, %v4479_v21  ;;  %v1477_v28 = vrot.slane %v5000_v23, %v4609_v54 }
 0x25d   : > { %v3580_v58 = vrot.slane %v3566_v14, %v4632_v10  ;;  %v2654_v59 = vcombine.low %v1433_v44, %v1437_v45  ;;  %v2661_v49 = vrot.slane %v2651_v29, %v4632_v10  ;;  %v2668_v25 = vrot.slane %v2652_v50, %v4632_v10  ;;  %v3641_v55 = vpop.permute.xlu0 %3640 }
 0x25e   : > { %v2675_v47 = vrot.slane %v2653_v33, %v4632_v10  ;;  %v1481_v60 = vrot.slane %v5000_v23, %v4612_v56  ;;  %v1485_v61 = vrot.slane %v5000_v23, %v4616_v62  ;;  %v1489_v21 = vrot.slane %v5000_v23, %v4620_v0 }
 0x25f   : > { %v3581_v22 = vcombine.low %v3573_v51, %v3580_v58  ;;  %v2682_v54 = vrot.slane %v2654_v59, %v4632_v10  ;;  %v2683_v30 = vcombine.low %v2661_v49, %v2668_v25  ;;  %v1493_v3 = vrot.slane %v5000_v23, %v4623_v1  ;;  %v3632_v31 = vpop.permute.xlu1 %3631 }
 0x260   : > { %v1497_v4 = vrot.slane %v5000_v23, %v4626_v5  ;;  %v1501_v6 = vrot.slane %v5000_v23, %v4629_v26  ;;  %v2749_v56 = vcombine.low %v1473_v32, %v1477_v28  ;;  %v2750_v8 = vcombine.low %v1481_v60, %v1485_v61 }
 0x261   : > { %3676 = vperm.xlu0 %4137, %v3581_v22   ;;  %v2684_v62 = vcombine.low %v2675_v47, %v2682_v54  ;;  %v2691_v11 = vrot.slane %v2683_v30, %v4632_v10  ;;  %v2751_v0 = vcombine.low %v1489_v21, %v1493_v3  ;;  %v3635_v43 = vpop.permute.xlu0 %3634  ;;  %v5425_v40 = vand.u32 127, %v599_v17 }
 0x262   : > { %v2752_v7 = vcombine.low %v1497_v4, %v1501_v6  ;;  %v2759_v48 = vrot.slane %v2749_v56, %v4632_v10  ;;  %v2766_v13 = vrot.slane %v2750_v8, %v4632_v10 }
 0x263   : > { %v2698_v1 = vrot.slane %v2684_v62, %v4632_v10  ;;  %v2773_v15 = vrot.slane %v2751_v0, %v4632_v10  ;;  %v5410_v34 = vpop.permute.xlu1 %3592  ;;  %v3684_v42 = vadd.s32 4294967288, %v5425_v40  ;;  %v3691_v14 = vadd.s32 4294967280, %v5425_v40 }
 0x264   : > { %v2780_v5 = vrot.slane %v2752_v7, %v4632_v10  ;;  %v2781_v16 = vcombine.low %v2759_v48, %v2766_v13  ;;  %v3682_v45 = vsub.s32 %v5425_v40, %v4473_v18  ;;  %v3698_v29 = vadd.s32 4294967272, %v5425_v40 }
 0x265   : > { %v2699_v26 = vcombine.low %v2691_v11, %v2698_v1  ;;  %v3687_v44 = vsub.s32 %v3684_v42, %v4473_v18  ;;  %v3705_v33 = vadd.s32 4294967264, %v5425_v40  ;;  %v3694_v58 = vsub.s32 %v3691_v14, %v4473_v18 }
 0x266   : > { %v2782_v23 = vcombine.low %v2773_v15, %v2780_v5  ;;  %v2789_v19 = vrot.slane %v2781_v16, %v4632_v10  ;;  %v3792_v28 = vrot.slane %v3632_v31, %v3682_v45  ;;  %v3701_v59 = vsub.s32 %v3698_v29, %v4473_v18 }
 0x267   : > { %3622 = vperm.xlu1 %4136, %v2699_v26   ;;  %v3796_v50 = vrot.slane %v3635_v43, %v3687_v44  ;;  %v3712_v25 = vadd.s32 4294967256, %v5425_v40  ;;  %v3801_v47 = vrot.slane %v3638_v53, %v3694_v58  ;;  %v3708_v60 = vsub.s32 %v3705_v33, %v4473_v18 }
 0x268   : > { %v2796_v20 = vrot.slane %v2782_v23, %v4632_v10  ;;  %v3683_v3 = vrot.slane %v3584_v37, %v3682_v45  ;;  %v3806_v4 = vrot.slane %v3641_v55, %v3701_v59  ;;  %v3719_v56 = vadd.s32 4294967248, %v5425_v40 }
 0x269   : > { %v3587_v36 = vpop.permute.xlu1 %3586  ;;  %v3797_v49 = vsel %vm3689_vm2, %v3796_v50, %v3792_v28  ;;  %v3715_v6 = vsub.s32 %v3712_v25, %v4473_v18  ;;  %v3726_v62 = vadd.s32 4294967240, %v5425_v40  ;;  %v3695_v0 = vrot.slane %v3590_v9, %v3694_v58 }
 0x26a   : > { %v2797_v27 = vcombine.low %v2789_v19, %v2796_v20  ;;  %v3688_v61 = vrot.slane %v3587_v36, %v3687_v44  ;;  %v3802_v22 = vsel %vm3696_vm3, %v3801_v47, %v3797_v49  ;;  %v3733_v48 = vadd.s32 4294967232, %v5425_v40 }
 0x26b   : > { %v3807_v11 = vsel %vm3703_vm4, %v3806_v4, %v3802_v22  ;;  %v3702_v15 = vrot.slane %v5410_v34, %v3701_v59  ;;  %v3722_v16 = vsub.s32 %v3719_v56, %v4473_v18  ;;  %v3729_v19 = vsub.s32 %v3726_v62, %v4473_v18 }
 0x26c   : > { %3628 = vperm.xlu1 %4136, %v2797_v27   ;;  %v3690_v8 = vsel %vm3689_vm2, %v3688_v61, %v3683_v3  ;;  %v3736_v53 = vsub.s32 %v3733_v48, %v4473_v18  ;;  %v3747_v34 = vadd.s32 4294967216, %v5425_v40  ;;  %v3740_v36 = vadd.s32 4294967224, %v5425_v40 }
 0x26d   : > { %v3697_v5 = vsel %vm3696_vm3, %v3695_v0, %v3690_v8  ;;  %v3761_v33 = vadd.s32 4294967200, %v5425_v40  ;;  %v3768_v58 = vadd.s32 4294967192, %v5425_v40 }
 0x26e   : > { %v3704_v31 = vsel %vm3703_vm4, %v3702_v15, %v3697_v5  ;;  %v3750_v44 = vsub.s32 %v3747_v34, %v4473_v18  ;;  %v3743_v14 = vsub.s32 %v3740_v36, %v4473_v18 }
 0x270   : > { %v5412_v12 = vpop.permute.xlu1 %3601 }
 0x276   : > { %v5418_v2 = vpop.permute.xlu0 %3652 }
 0x277   : > { %v3826_v43 = vrot.slane %v5418_v2, %v3729_v19 }
 0x27c   : > { %v5414_v63 = vpop.permute.xlu1 %3649 }
 0x27d   : > { %v3821_v9 = vrot.slane %v5414_v63, %v3722_v16  ;;  %v3723_v63 = vrot.slane %v5412_v12, %v3722_v16 }
 0x282   : > { %v3647_v38 = vpop.permute.xlu0 %3646 }
 0x283   : > { %v3816_v13 = vrot.slane %v3647_v38, %v3715_v6 }
 0x287   : > { %v5416_v35 = vpop.permute.xlu1 %3595 }
 0x288   : > { %v3709_v26 = vrot.slane %v5416_v35, %v3708_v60 }
 0x28a   : > { %v3711_v37 = vsel %vm3710_vm5, %v3709_v26, %v3704_v31 }
 0x28c   : > { %v5427_v41 = vpop.permute.xlu0 %3661 }
 0x292   : > { %v3644_v52 = vpop.permute.xlu1 %3643 }
 0x293   : > { %v3811_v54 = vrot.slane %v3644_v52, %v3708_v60  ;;  %v3841_v60 = vrot.slane %v5427_v41, %v3750_v44 }
 0x295   : > { %v3812_v7 = vsel %vm3710_vm5, %v3811_v54, %v3807_v11  ;;  %v3782_v54 = vadd.s32 4294967176, %v5425_v40 }
 0x296   : > { %v3817_v20 = vsel %vm3717_vm6, %v3816_v13, %v3812_v7 }
 0x297   : > { %v5420_v24 = vpop.permute.xlu1 %3604  ;;  %v3822_v35 = vsel %vm3724_vm7, %v3821_v9, %v3817_v20 }
 0x298   : > { %v3827_v45 = vsel %vm3731_vm8, %v3826_v43, %v3822_v35  ;;  %v3730_v28 = vrot.slane %v5420_v24, %v3729_v19  ;;  %v3771_v24 = vsub.s32 %v3768_v58, %v4473_v18 }
 0x29c   : > { %v5432_v57 = vpop.permute.xlu0 %3664 }
 0x2a1   : > { %v5422_v39 = vpop.permute.xlu1 %3598 }
 0x2a2   : > { %v3716_v27 = vrot.slane %v5422_v39, %v3715_v6  ;;  %v3754_v39 = vadd.s32 4294967208, %v5425_v40 }
 0x2a4   : > { %v3718_v52 = vsel %vm3717_vm6, %v3716_v27, %v3711_v37  ;;  %v3757_v59 = vsub.s32 %v3754_v39, %v4473_v18 }
 0x2a5   : > { %v3725_v29 = vsel %vm3724_vm7, %v3723_v63, %v3718_v52 }
 0x2a6   : > { %v3732_v49 = vsel %vm3731_vm8, %v3730_v28, %v3725_v29  ;;  %v3846_v4 = vrot.slane %v5432_v57, %v3757_v59 }
 0x2a7   : > { %v5430_v46 = vpop.permute.xlu1 %3613 }
 0x2a8   : > { %v3751_v56 = vrot.slane %v5430_v46, %v3750_v44 }
 0x2ac   : > { %v5442_v32 = vpop.permute.xlu0 %3610 }
 0x2ad   : > { %v3744_v22 = vrot.slane %v5442_v32, %v3743_v14 }
 0x2b1   : > { %v5439_v51 = vpop.permute.xlu1 %3607 }
 0x2b2   : > { %v3737_v2 = vrot.slane %v5439_v51, %v3736_v53  ;;  %v3764_v51 = vsub.s32 %v3761_v33, %v4473_v18 }
 0x2b4   : > { %v3739_v61 = vsel %vm3738_vm9, %v3737_v2, %v3732_v49 }
 0x2b5   : > { %v3746_v41 = vsel %vm3745_vm10, %v3744_v22, %v3739_v61 }
 0x2b6   : > { %v3659_v30 = vpop.permute.xlu0 %3658  ;;  %v3753_v57 = vsel %vm3752_vm11, %v3751_v56, %v3746_v41 }
 0x2b7   : > { %v3836_v12 = vrot.slane %v3659_v30, %v3743_v14  ;;  %v3775_v30 = vadd.s32 4294967184, %v5425_v40  ;;  %v3785_v40 = vsub.s32 %v3782_v54, %v4473_v18 }
 0x2b9   : > { %v3778_v7 = vsub.s32 %v3775_v30, %v4473_v18 }
 0x2bc   : > { %v3656_v21 = vpop.permute.xlu1 %3655 }
 0x2bd   : > { %v3831_v55 = vrot.slane %v3656_v21, %v3736_v53 }
 0x2bf   : > { %v3832_v50 = vsel %vm3738_vm9, %v3831_v55, %v3827_v45 }
 0x2c0   : > { %v3837_v25 = vsel %vm3745_vm10, %v3836_v12, %v3832_v50 }
 0x2c1   : > { %v5463_v23 = vpop.permute.xlu0 %3673  ;;  %v3842_v3 = vsel %vm3752_vm11, %v3841_v60, %v3837_v25 }
 0x2c2   : > { %v3847_v62 = vsel %vm3759_vm12, %v3846_v4, %v3842_v3  ;;  %v3861_v19 = vrot.slane %v5463_v23, %v3778_v7 }
 0x2c6   : > { %v5457_v1 = vpop.permute.xlu1 %3616 }
 0x2c7   : > { %v3758_v6 = vrot.slane %v5457_v1, %v3757_v59 }
 0x2c9   : > { %v3760_v1 = vsel %vm3759_vm12, %v3758_v6, %v3753_v57 }
 0x2cb   : > { %v3668_v42 = vpop.permute.xlu0 %3667 }
 0x2cc   : > { %v3851_v32 = vrot.slane %v3668_v42, %v3764_v51 }
 0x2ce   : > { %v3852_v46 = vsel %vm3766_vm13, %v3851_v32, %v3847_v62 }
 0x2d1   : > { %v5477_v38 = vpop.permute.xlu1 %3625 }
 0x2d2   : > { %v3779_v18 = vrot.slane %v5477_v38, %v3778_v7 }
 0x2d6   : > { %v3671_v21 = vpop.permute.xlu0 %3670 }
 0x2d7   : > { %v3856_v11 = vrot.slane %v3671_v21, %v3771_v24 }
 0x2d9   : > { %v3857_v5 = vsel %vm3773_vm14, %v3856_v11, %v3852_v46 }
 0x2da   : > { %v3862_v9 = vsel %vm3780_vm15, %v3861_v19, %v3857_v5 }
 0x2db   : > { %v3620_v47 = vpop.permute.xlu1 %3619 }
 0x2dc   : > { %v3765_v8 = vrot.slane %v3620_v47, %v3764_v51 }
 0x2de   : > { %v3767_v15 = vsel %vm3766_vm13, %v3765_v8, %v3760_v1 }
 0x2e0   : > { %v3677_v48 = vpop.permute.xlu0 %3676 }
 0x2e1   : > { %v3866_v16 = vrot.slane %v3677_v48, %v3785_v40 }
 0x2e3   : > { %v3867_v31 = vsel %vm3787_vm0, %v3866_v16, %v3862_v9 }
 0x2e6   : > { %v3623_v0 = vpop.permute.xlu1 %3622 }
 0x2e7   : > { %v3772_v13 = vrot.slane %v3623_v0, %v3771_v24 }
 0x2e9   : > { %v3774_v26 = vsel %vm3773_vm14, %v3772_v13, %v3767_v15 }
 0x2ea   : > { %v3781_v53 = vsel %vm3780_vm15, %v3779_v18, %v3774_v26 }
 0x2eb   : > { %v3629_v20 = vpop.permute.xlu1 %3628 }
 0x2ec   : > { %v3786_v27 = vrot.slane %v3629_v20, %v3785_v40 }
 0x2ee   : > { %v3788_v34 = vsel %vm3787_vm0, %v3786_v27, %v3781_v53 }
 0x2ef   : > { %v3868_v36 = vcombine.low %v3788_v34, %v3867_v31 }
 0x2f1   : > { %v3875_v37 = vrot.slane %v3868_v36, %v4632_v10 }
 0x2f3   : > { %v3882_v35 = vrot.slane %v3875_v37, %v4632_v10 }
 0x2f5   : > { %3888 = vst.msk [vmem:[%s219_s24] sm:$0x3] %vm3886_vm1, %v3882_v35 }
 0x2f6   : > { %4296 = shalt.err (!%p4293_p3)
}
 0x2f7   : > { %s4297_s8 = scalar_lea.hbm %s5518_s7, 32  ;;  %s4301_s16 = scalar_lea.hbm %s5565_s5, 128 }
 0x2f8   : > { %p4298_p4 = scmp.ne.s32.totalorder %s5518_s7, %s4297_s8  ;;  %p4302_p9 = scmp.lt.u32.totalorder %s5518_s7, %s5565_s5 }
 0x2f9   : > { %p4303_p10 = scmp.lt.u32.totalorder %s4301_s16, %s4297_s8  ;;  %p4305_p12 = scmp.lt.u32.totalorder %s4297_s8, %s5518_s7 }
 0x2fa   : > { %p4299_p7 = pnand %p4298_p4, %p4418_p5 }
 0x2fb   : > { %p4304_p11 = por %p4303_p10, %p4302_p9 }
 0x2fc   : > { %p4300_p8 = pneg %p4299_p7 }
 0x2fd   : > { %p4306_p13 = por %p4305_p12, %p4304_p11 }
 0x2ff   : > { %p4307_p0 = pnand %p4306_p13, %p4300_p8 }
 0x301   : > { %4310 = shalt.err (!%p4307_p0)
}
 0x302   : > { %4095 = dma.vmem_to_hbm [thread:$0]  (%p4418_p5), %s5520_s26, 32, %s5518_s7, %s3890_s9  }
 0x303 PF: > { %p4101_p1 = scmp.ge.s32.totalorder %s4345_s23, 2  ;;  %s3916_s19 = sand.u32 1, %s4333_s20  }
 0x304   : > { %s3917_s4 = scalar_lea.sflag [#allocation4], %s3916_s19 }
 0x305   : > { %p4098_p2 = pnand %p4101_p1, %p4422_p6 }
 0x307   : > { %4328 = dma.done.wait (!%p4098_p2), %s3917_s4, 32  }
 0x308   : > { %4330 = vsyncadd (!%p4098_p2), %s3917_s4, 4294967264  ;;  %p16_p3 = scmp.ge.s32.totalorder %s4406_s25, 6   ;;  %s5568_s20 = smov %s4337_s21 }
 0x309   : > { %s5569_s21 = smov %s4341_s22  ;;  %s5570_s22 = smov %s4416_s28 }
 0x30a   : > { %s5571_s23 = smov %s4406_s25  ;;  %18 = sbr.rel (!%p16_p3) target bundleno = 5 (0x5), region = 75 }
 0x311   :  { %3922 = vsyncpa [#allocation4], 1 }
 0x312   :  { %3924 = vsyncpa [#allocation4 + $0x1], 1 }

</bundles_post_ra>
